<compile_context>
chip_gen: v5e
topology: v5e:2x2
jax: 0.10.0
libtpu: 0.0.40
codegen_flags: <defaults>
</compile_context>

<pallas_src>
import jax
import jax.numpy as jnp
from jax import lax
from jax.experimental import pallas as pl
from jax.experimental.pallas import tpu as pltpu

_LANES = 128
_SUBLANES = 8


def _round_up(v, m):
    return (v + m - 1) // m * m


def _pad2d(a, rows, cols):
    r, c = a.shape
    return jnp.pad(a, ((0, rows - r), (0, cols - c)))


def _make_kernel(inv_m):
    """inv_m = 1/M (number of *real* constraint rows) baked in as a constant."""

    def kernel(p_ref, x_ref,                         # (TB, Dp'), (TB, Dx')
               A_ref, C_ref, b_ref,                  # (M', Dx'), (M', Dp'), (1, M')
               W1p_ref, W1x_ref, W1g_ref, b1_ref,    # (Dp', H'), (Dx', H'), (Dx', H'), (1, H')
               W2_ref, b2_ref,                       # (H', Dx'), (1, Dx')
               out_ref):                             # (TB, Dx')
        f32 = jnp.float32
        p = p_ref[...]
        x = x_ref[...]
        A = A_ref[...]

        # z = x @ A^T + p @ C^T - b  (contract feature dims; no transposed
        # copies of A / C are shipped to VMEM).  Padded constraint rows are
        # all-zero, so z == 0 there and they never activate the mask.
        dn = (((1,), (1,)), ((), ()))
        z = (lax.dot_general(x, A, dn, preferred_element_type=f32)
             + lax.dot_general(p, C_ref[...], dn, preferred_element_type=f32)
             - b_ref[...].astype(f32))

        # energy_b = mean_j |relu(z)_{b,j}|  =>  d energy / d x = (1/M) mask @ A
        mask = (z > 0.0).astype(A.dtype)
        grad_x = jnp.dot(mask, A, preferred_element_type=f32) * inv_m

        # layers(cat([p, x, grad], -1)) without the lane-concatenate:
        # W1 split into three slabs, accumulated directly on the MXU.
        h_pre = (jnp.dot(p, W1p_ref[...], preferred_element_type=f32)
                 + jnp.dot(x, W1x_ref[...], preferred_element_type=f32)
                 + jnp.dot(grad_x.astype(W1g_ref.dtype), W1g_ref[...],
                           preferred_element_type=f32)
                 + b1_ref[...].astype(f32))
        h = jnp.maximum(h_pre, 0.0)
        mlp = (jnp.dot(h.astype(W2_ref.dtype), W2_ref[...],
                       preferred_element_type=f32)
               + b2_ref[...].astype(f32))

        # residual update; lane-dense (TB, Dx') store, no in-kernel slice.
        out_ref[...] = x.astype(f32) + mlp

    return kernel


def sol_pred_grad_proj(data, params, *, tile_b=128, param_dtype=jnp.float32):
    """Forward pass of solPredGradProj as one Pallas kernel.

    param_dtype=jnp.bfloat16 enables the bf16 MXU path (f32 accumulation) for
    v6e/v7x; float32 keeps full precision.
    """
    p = jnp.asarray(data["p"], jnp.float32)
    x = jnp.asarray(data["x"], jnp.float32)
    B, Dp = p.shape
    _, Dx = x.shape
    A, C, b = params["A"], params["C"], params["b"]
    W1, b1, W2, b2 = params["W1"], params["b1"], params["W2"], params["b2"]
    M = A.shape[0]
    H = W1.shape[1]

    # Lane-dense padding: feature dims -> multiples of 128; batch tile is a
    # multiple of 8 sublanes.  Zero padding is exact: padded constraints give
    # z == 0 (mask 0), padded weight rows/cols contribute 0, padded hidden
    # units stay at relu(0) = 0, padded output columns are exactly 0.
    tile_b = _round_up(max(tile_b, _SUBLANES), _SUBLANES)
    Bp = _round_up(B, tile_b)
    Dpp = _round_up(Dp, _LANES)
    Dxp = _round_up(Dx, _LANES)
    Mp = _round_up(M, _LANES)
    Hp = _round_up(H, _LANES)

    cast = lambda a: jnp.asarray(a, jnp.float32).astype(param_dtype)
    p_p = cast(_pad2d(p, Bp, Dpp))
    x_p = cast(_pad2d(x, Bp, Dxp))
    A_p = cast(_pad2d(A, Mp, Dxp))
    C_p = cast(_pad2d(C, Mp, Dpp))
    b_p = cast(_pad2d(b, 1, Mp))
    # Split W1 so the kernel never concatenates [p, x, grad] along lanes.
    W1p = cast(_pad2d(W1[:Dp], Dpp, Hp))
    W1x = cast(_pad2d(W1[Dp:Dp + Dx], Dxp, Hp))
    W1g = cast(_pad2d(W1[Dp + Dx:], Dxp, Hp))
    b1_p = cast(_pad2d(b1, 1, Hp))
    W2_p = cast(_pad2d(W2, Hp, Dxp))
    b2_p = cast(_pad2d(b2, 1, Dxp))

    grid = (Bp // tile_b,)

    def tiled(cols):
        return pl.BlockSpec((tile_b, cols), lambda i: (i, 0))

    def whole(rows, cols):
        return pl.BlockSpec((rows, cols), lambda i: (0, 0))

    itemsize = jnp.dtype(param_dtype).itemsize
    flops = 2 * Bp * (Dxp * Mp + Dpp * Mp + Mp * Dxp
                      + Dpp * Hp + 2 * Dxp * Hp + Hp * Dxp)
    bytes_accessed = (itemsize * (Bp * (Dpp + Dxp)
                                  + Mp * (Dxp + Dpp) + Mp
                                  + (Dpp + 2 * Dxp) * Hp + Hp
                                  + Hp * Dxp + Dxp)
                      + 4 * Bp * Dxp)

    out = pl.pallas_call(
        _make_kernel(1.0 / M),
        out_shape=jax.ShapeDtypeStruct((Bp, Dxp), jnp.float32),
        grid=grid,
        in_specs=[
            tiled(Dpp), tiled(Dxp),
            whole(Mp, Dxp), whole(Mp, Dpp), whole(1, Mp),
            whole(Dpp, Hp), whole(Dxp, Hp), whole(Dxp, Hp), whole(1, Hp),
            whole(Hp, Dxp), whole(1, Dxp),
        ],
        out_specs=tiled(Dxp),
        compiler_params=pltpu.CompilerParams(
            dimension_semantics=("parallel",),
            vmem_limit_bytes=32 * 1024 * 1024,   # generous headroom, fits v7x 64 MiB
        ),
        cost_estimate=pl.CostEstimate(
            flops=flops, transcendentals=0, bytes_accessed=bytes_accessed),
    )(p_p, x_p, A_p, C_p, b_p, W1p, W1x, W1g, b1_p, W2_p, b2_p)

    new_data = dict(data)
    # TODO(synk): the original PyTorch slices out[:, :dim+1], which is
    # shape-inconsistent with the residual add; we use the consistent Dx slice.
    new_data["x_out"] = out[:B, :Dx]
    return new_data


def _reference(data, params):
    """Pure-JAX reference of the same forward math (for a sanity check)."""
    hp = lax.Precision.HIGHEST
    p, x = data["p"], data["x"]
    A, C, b = params["A"], params["C"], params["b"]
    W1, b1, W2, b2 = params["W1"], params["b1"], params["W2"], params["b2"]
    z = jnp.dot(x, A.T, precision=hp) + jnp.dot(p, C.T, precision=hp) - b
    grad_x = jnp.dot((z > 0.0).astype(jnp.float32), A, precision=hp) / z.shape[1]
    f = jnp.concatenate([p, x, grad_x], axis=-1)
    h = jnp.maximum(jnp.dot(f, W1, precision=hp) + b1, 0.0)
    out = jnp.dot(h, W2, precision=hp) + b2
    return x + out[:, : x.shape[1]]


if __name__ == "__main__":
    # Deterministic synthetic shapes (kept modest; features pad to 128 lanes,
    # batch gives 4 parallel grid steps at tile_b=128).
    B, Dp, Dx, M, H = 512, 16, 16, 32, 32
    key = jax.random.PRNGKey(0)
    kp, kx, kA, kC, kb, k1, k2, k3, k4 = jax.random.split(key, 9)

    data = {
        "p": jax.random.normal(kp, (B, Dp), jnp.float32),
        "x": jax.random.normal(kx, (B, Dx), jnp.float32),
    }
    params = {
        # synthetic linear inequality constraint: relu(x A^T + p C^T - b)
        "A": 0.5 * jax.random.normal(kA, (M, Dx), jnp.float32),
        "C": 0.5 * jax.random.normal(kC, (M, Dp), jnp.float32),
        "b": 0.1 * jax.random.normal(kb, (1, M), jnp.float32),
        # self.layers: Linear(Dp+2Dx -> H) + ReLU + Linear(H -> Dx)
        "W1": 0.1 * jax.random.normal(k1, (Dp + 2 * Dx, H), jnp.float32),
        "b1": 0.1 * jax.random.normal(k2, (1, H), jnp.float32),
        "W2": 0.1 * jax.random.normal(k3, (H, Dx), jnp.float32),
        "b2": 0.1 * jax.random.normal(k4, (1, Dx), jnp.float32),
    }

    ref = _reference(data, params)

    # ---- float32 path: tight check ------------------------------------------
    out = jax.block_until_ready(
        sol_pred_grad_proj(data, params, tile_b=128)["x_out"])
    assert out.shape == (B, Dx)
    err = jnp.abs(out - ref)
    tol = 1e-4 + 1e-4 * jnp.abs(ref)
    # A relu-mask tie exactly at z == 0 can resolve differently between the two
    # MXU accumulation orders; allow a tiny fraction of elements outside the
    # tight tolerance, but cap the absolute deviation everywhere.
    assert float(jnp.mean((err <= tol).astype(jnp.float32))) >= 0.995, "f32 mismatch"
    assert float(jnp.max(err)) <= 5e-2, "f32 large deviation vs reference"

    # ---- bfloat16 weights/activations path (v6e/v7x MXU): loose check -------
    out_bf16 = jax.block_until_ready(
        sol_pred_grad_proj(data, params, tile_b=128,
                           param_dtype=jnp.bfloat16)["x_out"])
    assert out_bf16.shape == (B, Dx)
    assert bool(jnp.all(jnp.isfinite(out_bf16)))
    assert jnp.allclose(out_bf16, ref, atol=2e-1, rtol=1e-1), "bf16 diverged"

    print("KERNEL_OK")
</pallas_src>

<mosaic_0001>
module attributes {stable_mosaic.version = 11 : i64} {
  func.func @kernel(%arg0: i32, %arg1: memref<128x128xf32, #tpu.memory_space<vmem>>, %arg2: memref<128x128xf32, #tpu.memory_space<vmem>>, %arg3: memref<128x128xf32, #tpu.memory_space<vmem>>, %arg4: memref<128x128xf32, #tpu.memory_space<vmem>>, %arg5: memref<1x128xf32, #tpu.memory_space<vmem>>, %arg6: memref<128x128xf32, #tpu.memory_space<vmem>>, %arg7: memref<128x128xf32, #tpu.memory_space<vmem>>, %arg8: memref<128x128xf32, #tpu.memory_space<vmem>>, %arg9: memref<1x128xf32, #tpu.memory_space<vmem>>, %arg10: memref<128x128xf32, #tpu.memory_space<vmem>>, %arg11: memref<1x128xf32, #tpu.memory_space<vmem>>, %arg12: memref<128x128xf32, #tpu.memory_space<vmem>>) attributes {dimension_semantics = [#tpu.dimension_semantics<parallel>], iteration_bounds = array<i64: 4>, scalar_prefetch = 0 : i64, scratch_operands = 0 : i64, tpu.core_type = #tpu.core_type<tc>, window_params = [{transform_indices = @transform_0, window_bounds = array<i64: 128, 128>}, {transform_indices = @transform_1, window_bounds = array<i64: 128, 128>}, {pipeline_mode = #tpu.pipeline_mode<synchronous>, transform_indices = @transform_2, window_bounds = array<i64: 128, 128>}, {pipeline_mode = #tpu.pipeline_mode<synchronous>, transform_indices = @transform_3, window_bounds = array<i64: 128, 128>}, {pipeline_mode = #tpu.pipeline_mode<synchronous>, transform_indices = @transform_4, window_bounds = array<i64: 1, 128>}, {pipeline_mode = #tpu.pipeline_mode<synchronous>, transform_indices = @transform_5, window_bounds = array<i64: 128, 128>}, {pipeline_mode = #tpu.pipeline_mode<synchronous>, transform_indices = @transform_6, window_bounds = array<i64: 128, 128>}, {pipeline_mode = #tpu.pipeline_mode<synchronous>, transform_indices = @transform_7, window_bounds = array<i64: 128, 128>}, {pipeline_mode = #tpu.pipeline_mode<synchronous>, transform_indices = @transform_8, window_bounds = array<i64: 1, 128>}, {pipeline_mode = #tpu.pipeline_mode<synchronous>, transform_indices = @transform_9, window_bounds = array<i64: 128, 128>}, {pipeline_mode = #tpu.pipeline_mode<synchronous>, transform_indices = @transform_10, window_bounds = array<i64: 1, 128>}, {transform_indices = @transform_11, window_bounds = array<i64: 128, 128>}]} {
    %c0 = arith.constant 0 : index
    %c0_0 = arith.constant 0 : index
    %0 = vector.load %arg1[%c0, %c0_0] : memref<128x128xf32, #tpu.memory_space<vmem>>, vector<128x128xf32>
    %c0_1 = arith.constant 0 : index
    %c0_2 = arith.constant 0 : index
    %1 = vector.load %arg2[%c0_1, %c0_2] : memref<128x128xf32, #tpu.memory_space<vmem>>, vector<128x128xf32>
    %c0_3 = arith.constant 0 : index
    %c0_4 = arith.constant 0 : index
    %2 = vector.load %arg3[%c0_3, %c0_4] : memref<128x128xf32, #tpu.memory_space<vmem>>, vector<128x128xf32>
    %cst = arith.constant dense<0.000000e+00> : vector<128x128xf32>
    %3 = tpu.matmul %1, %2, %cst {dimension_numbers = #tpu.dot_dimension_numbers<[1], [1], [0], [0], [0, 0, 1, 0], [], []>} : vector<128x128xf32>, vector<128x128xf32>, vector<128x128xf32> -> vector<128x128xf32>
    %c0_5 = arith.constant 0 : index
    %c0_6 = arith.constant 0 : index
    %4 = vector.load %arg4[%c0_5, %c0_6] : memref<128x128xf32, #tpu.memory_space<vmem>>, vector<128x128xf32>
    %cst_7 = arith.constant dense<0.000000e+00> : vector<128x128xf32>
    %5 = tpu.matmul %0, %4, %cst_7 {dimension_numbers = #tpu.dot_dimension_numbers<[1], [1], [0], [0], [0, 0, 1, 0], [], []>} : vector<128x128xf32>, vector<128x128xf32>, vector<128x128xf32> -> vector<128x128xf32>
    %6 = arith.addf %3, %5 : vector<128x128xf32>
    %c0_8 = arith.constant 0 : index
    %c0_9 = arith.constant 0 : index
    %7 = vector.load %arg5[%c0_8, %c0_9] : memref<1x128xf32, #tpu.memory_space<vmem>>, vector<1x128xf32>
    %8 = vector.broadcast %7 : vector<1x128xf32> to vector<128x128xf32>
    %9 = arith.subf %6, %8 : vector<128x128xf32>
    %cst_10 = arith.constant 0.000000e+00 : f32
    %10 = vector.broadcast %cst_10 : f32 to vector<128x128xf32>
    %11 = arith.cmpf ogt, %9, %10 : vector<128x128xf32>
    %12 = arith.extui %11 : vector<128x128xi1> to vector<128x128xi32>
    %13 = arith.sitofp %12 : vector<128x128xi32> to vector<128x128xf32>
    %cst_11 = arith.constant dense<0.000000e+00> : vector<128x128xf32>
    %14 = tpu.matmul %13, %2, %cst_11 {dimension_numbers = #tpu.dot_dimension_numbers<[1], [0], [0], [1], [0, 0, 1, 1], [], []>} : vector<128x128xf32>, vector<128x128xf32>, vector<128x128xf32> -> vector<128x128xf32>
    %cst_12 = arith.constant 3.125000e-02 : f32
    %15 = vector.broadcast %cst_12 : f32 to vector<128x128xf32>
    %16 = arith.mulf %14, %15 : vector<128x128xf32>
    %c0_13 = arith.constant 0 : index
    %c0_14 = arith.constant 0 : index
    %17 = vector.load %arg6[%c0_13, %c0_14] : memref<128x128xf32, #tpu.memory_space<vmem>>, vector<128x128xf32>
    %cst_15 = arith.constant dense<0.000000e+00> : vector<128x128xf32>
    %18 = tpu.matmul %0, %17, %cst_15 {dimension_numbers = #tpu.dot_dimension_numbers<[1], [0], [0], [1], [0, 0, 1, 1], [], []>} : vector<128x128xf32>, vector<128x128xf32>, vector<128x128xf32> -> vector<128x128xf32>
    %c0_16 = arith.constant 0 : index
    %c0_17 = arith.constant 0 : index
    %19 = vector.load %arg7[%c0_16, %c0_17] : memref<128x128xf32, #tpu.memory_space<vmem>>, vector<128x128xf32>
    %cst_18 = arith.constant dense<0.000000e+00> : vector<128x128xf32>
    %20 = tpu.matmul %1, %19, %cst_18 {dimension_numbers = #tpu.dot_dimension_numbers<[1], [0], [0], [1], [0, 0, 1, 1], [], []>} : vector<128x128xf32>, vector<128x128xf32>, vector<128x128xf32> -> vector<128x128xf32>
    %21 = arith.addf %18, %20 : vector<128x128xf32>
    %c0_19 = arith.constant 0 : index
    %c0_20 = arith.constant 0 : index
    %22 = vector.load %arg8[%c0_19, %c0_20] : memref<128x128xf32, #tpu.memory_space<vmem>>, vector<128x128xf32>
    %cst_21 = arith.constant dense<0.000000e+00> : vector<128x128xf32>
    %23 = tpu.matmul %16, %22, %cst_21 {dimension_numbers = #tpu.dot_dimension_numbers<[1], [0], [0], [1], [0, 0, 1, 1], [], []>} : vector<128x128xf32>, vector<128x128xf32>, vector<128x128xf32> -> vector<128x128xf32>
    %24 = arith.addf %21, %23 : vector<128x128xf32>
    %c0_22 = arith.constant 0 : index
    %c0_23 = arith.constant 0 : index
    %25 = vector.load %arg9[%c0_22, %c0_23] : memref<1x128xf32, #tpu.memory_space<vmem>>, vector<1x128xf32>
    %26 = vector.broadcast %25 : vector<1x128xf32> to vector<128x128xf32>
    %27 = arith.addf %24, %26 : vector<128x128xf32>
    %cst_24 = arith.constant 0.000000e+00 : f32
    %28 = vector.broadcast %cst_24 : f32 to vector<128x128xf32>
    %29 = arith.maximumf %27, %28 : vector<128x128xf32>
    %c0_25 = arith.constant 0 : index
    %c0_26 = arith.constant 0 : index
    %30 = vector.load %arg10[%c0_25, %c0_26] : memref<128x128xf32, #tpu.memory_space<vmem>>, vector<128x128xf32>
    %cst_27 = arith.constant dense<0.000000e+00> : vector<128x128xf32>
    %31 = tpu.matmul %29, %30, %cst_27 {dimension_numbers = #tpu.dot_dimension_numbers<[1], [0], [0], [1], [0, 0, 1, 1], [], []>} : vector<128x128xf32>, vector<128x128xf32>, vector<128x128xf32> -> vector<128x128xf32>
    %c0_28 = arith.constant 0 : index
    %c0_29 = arith.constant 0 : index
    %32 = vector.load %arg11[%c0_28, %c0_29] : memref<1x128xf32, #tpu.memory_space<vmem>>, vector<1x128xf32>
    %33 = vector.broadcast %32 : vector<1x128xf32> to vector<128x128xf32>
    %34 = arith.addf %31, %33 : vector<128x128xf32>
    %35 = arith.addf %1, %34 : vector<128x128xf32>
    %c0_30 = arith.constant 0 : index
    %c0_31 = arith.constant 0 : index
    %36 = vector.load %arg12[%c0_30, %c0_31] : memref<128x128xf32, #tpu.memory_space<vmem>>, vector<128x128xf32>
    tpu.vector_store %arg12[%c0_30, %c0_31], %35 {strides = array<i32>} : memref<128x128xf32, #tpu.memory_space<vmem>>, vector<128x128xf32>,
    return
  }
  func.func @transform_0(%arg0: i32) -> (i32, i32) {
    %c0_i32 = arith.constant 0 : i32
    %c0_i32_0 = arith.constant 0 : i32
    return %arg0, %c0_i32 : i32, i32
  }
  func.func @transform_1(%arg0: i32) -> (i32, i32) {
    %c0_i32 = arith.constant 0 : i32
    %c0_i32_0 = arith.constant 0 : i32
    return %arg0, %c0_i32 : i32, i32
  }
  func.func @transform_2(%arg0: i32) -> (i32, i32) {
    %c0_i32 = arith.constant 0 : i32
    %c0_i32_0 = arith.constant 0 : i32
    %c0_i32_1 = arith.constant 0 : i32
    return %c0_i32, %c0_i32_0 : i32, i32
  }
  func.func @transform_3(%arg0: i32) -> (i32, i32) {
    %c0_i32 = arith.constant 0 : i32
    %c0_i32_0 = arith.constant 0 : i32
    %c0_i32_1 = arith.constant 0 : i32
    return %c0_i32, %c0_i32_0 : i32, i32
  }
  func.func @transform_4(%arg0: i32) -> (i32, i32) {
    %c0_i32 = arith.constant 0 : i32
    %c0_i32_0 = arith.constant 0 : i32
    %c0_i32_1 = arith.constant 0 : i32
    return %c0_i32, %c0_i32_0 : i32, i32
  }
  func.func @transform_5(%arg0: i32) -> (i32, i32) {
    %c0_i32 = arith.constant 0 : i32
    %c0_i32_0 = arith.constant 0 : i32
    %c0_i32_1 = arith.constant 0 : i32
    return %c0_i32, %c0_i32_0 : i32, i32
  }
  func.func @transform_6(%arg0: i32) -> (i32, i32) {
    %c0_i32 = arith.constant 0 : i32
    %c0_i32_0 = arith.constant 0 : i32
    %c0_i32_1 = arith.constant 0 : i32
    return %c0_i32, %c0_i32_0 : i32, i32
  }
  func.func @transform_7(%arg0: i32) -> (i32, i32) {
    %c0_i32 = arith.constant 0 : i32
    %c0_i32_0 = arith.constant 0 : i32
    %c0_i32_1 = arith.constant 0 : i32
    return %c0_i32, %c0_i32_0 : i32, i32
  }
  func.func @transform_8(%arg0: i32) -> (i32, i32) {
    %c0_i32 = arith.constant 0 : i32
    %c0_i32_0 = arith.constant 0 : i32
    %c0_i32_1 = arith.constant 0 : i32
    return %c0_i32, %c0_i32_0 : i32, i32
  }
  func.func @transform_9(%arg0: i32) -> (i32, i32) {
    %c0_i32 = arith.constant 0 : i32
    %c0_i32_0 = arith.constant 0 : i32
    %c0_i32_1 = arith.constant 0 : i32
    return %c0_i32, %c0_i32_0 : i32, i32
  }
  func.func @transform_10(%arg0: i32) -> (i32, i32) {
    %c0_i32 = arith.constant 0 : i32
    %c0_i32_0 = arith.constant 0 : i32
    %c0_i32_1 = arith.constant 0 : i32
    return %c0_i32, %c0_i32_0 : i32, i32
  }
  func.func @transform_11(%arg0: i32) -> (i32, i32) {
    %c0_i32 = arith.constant 0 : i32
    %c0_i32_0 = arith.constant 0 : i32
    return %arg0, %c0_i32 : i32, i32
  }
}

</mosaic_0001>

<bundles_post_ra>
// kernel: tpu_custom_call.1
= control target key start
LH: loop header
LB: loop body
LE: loop exit
PB: predicated region body
PF: predicated region fallthrough
CT: control target
= control target key end

     0   :  { %s2651_s0 = inlined_call_operand.hbm [shape: f32[512,128], index: 0, kind: input, shape index: {}]   ;;  %s2652_s1 = inlined_call_operand.hbm [shape: f32[512,128], index: 1, kind: input, shape index: {}]   ;;  %s2653_s2 = inlined_call_operand.hbm [shape: f32[128,128], index: 2, kind: input, shape index: {}]   ;;  %s2654_s3 = inlined_call_operand.hbm [shape: f32[128,128], index: 3, kind: input, shape index: {}]   ;;  %s2655_s4 = inlined_call_operand.vmem [shape: f32[1,128], index: 4, kind: input, shape index: {}]   ;;  %s2656_s5 = inlined_call_operand.hbm [shape: f32[128,128], index: 5, kind: input, shape index: {}]   ;;  %s2657_s6 = inlined_call_operand.hbm [shape: f32[128,128], index: 6, kind: input, shape index: {}]   ;;  %s2658_s7 = inlined_call_operand.hbm [shape: f32[128,128], index: 7, kind: input, shape index: {}]   ;;  %s2659_s8 = inlined_call_operand.vmem [shape: f32[1,128], index: 8, kind: input, shape index: {}]   ;;  %s2660_s9 = inlined_call_operand.hbm [shape: f32[128,128], index: 9, kind: input, shape index: {}]   ;;  %s2661_s10 = inlined_call_operand.vmem [shape: f32[1,128], index: 10, kind: input, shape index: {}]   ;;  %s2662_s11 = inlined_call_operand.hbm [shape: f32[512,128], index: 11, kind: output, shape index: {}]  }
   0x1   :  { %2670 = sst [smem:[#allocation27_spill]] %s2651_s0 }
   0x2   :  { %2671 = sst [smem:[#allocation28_spill]] %s2653_s2 }
   0x3   :  { %2672 = sst [smem:[#allocation29_spill]] %s2654_s3 }
   0x4   :  { %2673 = sst [smem:[#allocation30_spill]] %s2656_s5 }
   0x5   :  { %2674 = sst [smem:[#allocation31_spill]] %s2657_s6 }
   0x6   :  { %2675 = sst [smem:[#allocation32_spill]] %s2658_s7 }
   0x7   :  { %2676 = sst [smem:[#allocation33_spill]] %s2660_s9 }
   0x8   :  { %16 = vsyncpa [#allocation3], 0 }
   0x9   :  { %18 = vsyncpa [#allocation3 + $0x1], 0 }
   0xa   :  { %19 = vsyncpa [#allocation6], 0 }
   0xb   :  { %21 = vsyncpa [#allocation6 + $0x1], 0 }
   0xc   :  { %22 = vsyncpa [#allocation9], 0 }
   0xd   :  { %23 = vsyncpa [#allocation12], 0 }
   0xe   :  { %24 = vsyncpa [#allocation15], 0 }
   0xf   :  { %25 = vsyncpa [#allocation4], 0 }
  0x10   :  { %27 = vsyncpa [#allocation4 + $0x1], 0  ;;  %s2086_s17 = smov 0   ;;  %s2088_s18 = smov 0  }
  0x11   :  { %s2090_s19 = smov 0   ;;  %s2092_s20 = smov 0  }
  0x12 LB: > { %2677 = sst [smem:[#allocation24_spill]] %s2009_s19  ;;  %s2110_s24 = sadd.s32 4294967295, %s2013_s20   ;;  %s2013_s20 = sphi %s2092_s20, %s2696_s20   ;;  %s2009_s19 = sphi %s2090_s19, %s2698_s19   ;;  %s2005_s18 = sphi %s2088_s18, %s2700_s18   ;;  %s2001_s17 = sphi %s2086_s17, %s2699_s17  }
  0x13   : > { %s2678_s2 = sld [smem:[#allocation28_spill]]  ;;  %p1476_p0 = scmp.ge.s32.totalorder %s2013_s20, 1 }
  0x14   : > { %p54_p1 = scmp.eq.s32.totalorder %s2110_s24, 0  ;;  %p305_p2 = scmp.lt.s32.totalorder %s2013_s20, 5 }
  0x15   : > { %s2015_s26 = smov [#allocation7]   ;;  %s2680_s3 = sld [smem:[#allocation29_spill]] }
  0x16   : > { %p2115_p3 = pnand %p1476_p0, %p305_p2  ;;  %s318_s27 = sshll.u32 %s2015_s26, 4  ;;  %s319_s27 = int_to_ptr.vmem [resolvable:$true] %s318_s27 }
  0x17   : > { %s2682_s6 = sld [smem:[#allocation31_spill]]  ;;  %s2016_s16 = smov [#allocation8]  }
  0x18   : > { %p1586_p4 = pneg %p2115_p3  ;;  %s332_s21 = sshll.u32 %s2016_s16, 4  ;;  %s333_s21 = int_to_ptr.vmem [resolvable:$true] %s332_s21 }
  0x19   : > { %s316_s23 = sshll.u32 %s2678_s2, 4  ;;  %s2663_s22 = smov 128   ;;  %s317_s23 = int_to_ptr.hbm [resolvable:$true] %s316_s23 }
  0x1a   : > { %p2126_p5 = pnand %p1586_p4, %p54_p1  ;;  %s2665_s26 = smov 8  }
  0x1b   : > { %s330_s30 = sshll.u32 %s2680_s3, 4  ;;  %s2683_s5 = sld [smem:[#allocation30_spill]]  ;;  %s331_s30 = int_to_ptr.hbm [resolvable:$true] %s330_s30 }
  0x1c   : > { %1589 = dma.hbm_to_vmem [thread:$0]  (!%p2126_p5), %s317_s23, 2048, %s319_s27, [#allocation6], %s2663_s22, %s2663_s22, %s2665_s26  }
  0x1d   : > { %s361_s15 = sshll.u32 %s2682_s6, 4  ;;  %s2019_s14 = smov [#allocation11]   ;;  %s362_s15 = int_to_ptr.hbm [resolvable:$true] %s361_s15 }
  0x1e   : > { %1592 = dma.hbm_to_vmem [thread:$0]  (!%p2126_p5), %s331_s30, 2048, %s333_s21, [#allocation9], %s2663_s22, %s2663_s22, %s2665_s26  }
  0x1f   : > { %s363_s16 = sshll.u32 %s2019_s14, 4  ;;  %s2020_s23 = smov [#allocation10]   ;;  %s364_s16 = int_to_ptr.vmem [resolvable:$true] %s363_s16 }
  0x20   : > { %1598 = dma.hbm_to_vmem [thread:$0]  (!%p2126_p5), %s362_s15, 2048, %s364_s16, [#allocation12], %s2663_s22, %s2663_s22, %s2665_s26  }
  0x21   : > { %s347_s13 = sshll.u32 %s2683_s5, 4  ;;  %s349_s27 = sshll.u32 %s2020_s23, 4  ;;  %s348_s13 = int_to_ptr.hbm [resolvable:$true] %s347_s13  ;;  %s350_s27 = int_to_ptr.vmem [resolvable:$true] %s349_s27 }
  0x22   : > { %s2684_s7 = sld [smem:[#allocation32_spill]]  ;;  %s2021_s14 = smov [#allocation13]  }
  0x23   : > { %1595 = dma.hbm_to_vmem [thread:$0]  (!%p2126_p5), %s348_s13, 2048, %s350_s27, [#allocation9], %s2663_s22, %s2663_s22, %s2665_s26  }
  0x24   : > { %s2685_s9 = sld [smem:[#allocation33_spill]]  ;;  %s377_s2 = sshll.u32 %s2021_s14, 4  ;;  %s378_s2 = int_to_ptr.vmem [resolvable:$true] %s377_s2 }
  0x25   : > { %s2022_s13 = smov [#allocation14]   ;;  %s1475_s23 = sadd.s32 4294967294, %s2013_s20  }
  0x26   : > { %s394_s16 = sshll.u32 %s2022_s13, 4  ;;  %s2174_s27 = sadd.s32 1, %s2013_s20   ;;  %s395_s16 = int_to_ptr.vmem [resolvable:$true] %s394_s16 }
  0x27   : > { %2686 = sst [smem:[#allocation25_spill]] %s2174_s27  ;;  %s37_s30 = ssub.s32 %s2013_s20, %s2174_s27 }
  0x28   : > { %s375_s21 = sshll.u32 %s2684_s7, 4  ;;  %s40_s28 = sadd.s32 1, %s2009_s19  ;;  %s376_s21 = int_to_ptr.hbm [resolvable:$true] %s375_s21 }
  0x29   : > { %1601 = dma.hbm_to_vmem [thread:$0]  (!%p2126_p5), %s376_s21, 2048, %s378_s2, [#allocation12], %s2663_s22, %s2663_s22, %s2665_s26  }
  0x2a   : > { %s392_s29 = sshll.u32 %s2685_s9, 4  ;;  %p38_p6 = scmp.eq.s32.totalorder %s37_s30, 0  ;;  %s393_s29 = int_to_ptr.hbm [resolvable:$true] %s392_s29 }
  0x2b   : > { %1604 = dma.hbm_to_vmem [thread:$0]  (!%p2126_p5), %s393_s29, 2048, %s395_s16, [#allocation15], %s2663_s22, %s2663_s22, %s2665_s26  }
  0x2c   : > { %p47_p7 = scmp.ne.s32.totalorder %s2009_s19, %s2005_s18  ;;  %p48_p8 = scmp.eq.s32.totalorder %s2013_s20, 0 }
  0x2d   : > { %p53_p9 = scmp.ne.s32.totalorder %s2005_s18, %s2001_s17  ;;  %p292_p12 = scmp.eq.s32.totalorder %s2110_s24, 3 }
  0x2e   : > { %s2185_s21 = scalar_select %p38_p6, %s2009_s19, %s40_s28  }
  0x2f   : > { %p2187_p10 = por %p48_p8, %p47_p7  ;;  %p2193_p11 = por %p54_p1, %p53_p9 }
  0x30   : > { %2687 = sst [smem:[#allocation26_spill]] %s2185_s21  ;;  %p298_p13 = scmp.eq.s32.totalorder %s1475_s23, 3 }
  0x31   : > { %p1622_p0 = scmp.lt.s32.totalorder %s2013_s20, 4  ;;  %s411_s29 = sand.u32 1, %s2009_s19  }
  0x32   : > { %p2200_p2 = por %p292_p12, %p47_p7  ;;  %p2204_p4 = por %p298_p13, %p53_p9 }
  0x33   : > { %s2208_s13 = sshll.u32 %s411_s29, 7  ;;  %s1537_s16 = sshll.u32 %s2013_s20, 7 }
  0x34   : > { %s2692_s0 = sld [smem:[#allocation27_spill]]  ;;  %s415_s26 = scalar_lea.vmem [#allocation2], %s2208_s13 }
  0x35   : > { %s423_s23 = sshll.u32 %s415_s26, 4  ;;  %p2217_p5 = pnand %p1622_p0, %p2187_p10  ;;  %s424_s23 = int_to_ptr.vmem [resolvable:$true] %s423_s23 }
  0x36   : > { %s442_s9 = scalar_lea.hbm %s2652_s1, %s1537_s16  ;;  %s412_s19 = scalar_lea.sflag [#allocation3], %s411_s29 }
  0x37   : > { %s443_s21 = sshll.u32 %s442_s9, 4  ;;  %p1871_p7 = pneg %p2217_p5  ;;  %s444_s21 = int_to_ptr.hbm [resolvable:$true] %s443_s21 }
  0x3a   : > { %s420_s22 = scalar_lea.hbm %s2692_s0, %s1537_s16  ;;  %s1874_s12 = scalar_lea.hbm %s2692_s0, 512 }
  0x3b   : > { %s421_s3 = sshll.u32 %s420_s22, 4  ;;  %s422_s3 = int_to_ptr.hbm [resolvable:$true] %s421_s3 }
  0x3c   : > { %s1867_s30 = sshra.s32 %s422_s3, 4  ;;  %s1868_s30 = int_to_ptr.hbm [resolvable:$true] %s1867_s30 }
  0x3d   : > { %s1869_s28 = scalar_lea.hbm %s1868_s30, 128  ;;  %p1875_p10 = scmp.lt.s32.totalorder %s1868_s30, %s2692_s0 }
  0x3e   : > { %p1870_p6 = scmp.ne.s32.totalorder %s1868_s30, %s1869_s28  ;;  %p1876_p12 = scmp.lt.s32.totalorder %s1874_s12, %s1869_s28 }
  0x40   : > { %p1872_p8 = pnand %p1871_p7, %p1870_p6  ;;  %p1877_p13 = por %p1876_p12, %p1875_p10 }
  0x42   : > { %p1873_p9 = pneg %p1872_p8 }
  0x44   : > { %p1878_p0 = pnand %p1877_p13, %p1873_p9 }
  0x46   : > { %1881 = shalt.err (!%p1878_p0)
}
  0x47   : > { %s2694_s9 = smov 8   ;;  %s2695_s29 = smov 128  }
  0x48   : > { %1608 = dma.hbm_to_vmem [thread:$0]  (!%p2217_p5), %s422_s3, 2048, %s424_s23, %s412_s19, %s2695_s29, %s2695_s29, %s2694_s9  }
  0x49   : > { %s437_s16 = scalar_lea.vmem [#allocation5], %s2208_s13  ;;  %s433_s26 = sand.u32 1, %s2013_s20  }
  0x4a   : > { %s445_s22 = sshll.u32 %s437_s16, 4  ;;  %s434_s6 = scalar_lea.sflag [#allocation6], %s433_s26  ;;  %s446_s22 = int_to_ptr.vmem [resolvable:$true] %s445_s22 }
  0x4b   : > { %s1897_s30 = sshra.s32 %s444_s21, 4  ;;  %s1904_s0 = scalar_lea.hbm %s2652_s1, 512  ;;  %s1898_s30 = int_to_ptr.hbm [resolvable:$true] %s1897_s30 }
  0x4c   : > { %s1899_s28 = scalar_lea.hbm %s1898_s30, 128  ;;  %p1905_p10 = scmp.lt.s32.totalorder %s1898_s30, %s2652_s1 }
  0x4d   : > { %p1900_p6 = scmp.ne.s32.totalorder %s1898_s30, %s1899_s28  ;;  %p1906_p12 = scmp.lt.s32.totalorder %s1904_s0, %s1899_s28 }
  0x4f   : > { %p1902_p8 = pnand %p1900_p6, %p1871_p7  ;;  %p1907_p13 = por %p1906_p12, %p1905_p10 }
  0x51   : > { %p1903_p9 = pneg %p1902_p8 }
  0x53   : > { %p1908_p0 = pnand %p1907_p13, %p1903_p9 }
  0x55   : > { %1911 = shalt.err (!%p1908_p0)
}
  0x56   : > { %1611 = dma.hbm_to_vmem [thread:$0]  (!%p2217_p5), %s444_s21, 2048, %s446_s22, %s434_s6, %s2695_s29, %s2695_s29, %s2694_s9  }
  0x57   : > { %457 = sbr.rel (%p2115_p3) target bundleno = 826 (0x33a), region = 64  ;;  %s2259_s19 = sand.u32 (!%p2115_p3), 1, %s2005_s18  }
  0x58   : > { %s2262_s27 = sshll.u32 (!%p2115_p3), %s2259_s19, 7  ;;  %s460_s0 = scalar_lea.sflag (!%p2115_p3), [#allocation3], %s2259_s19 }
  0x59   : > { %s2266_s13 = scalar_lea.vmem (!%p2115_p3), [#allocation2], %s2262_s27 }
  0x5c   : > { %1972 = dma.done.wait (%p2193_p11), %s460_s0, 2048  }
  0x5d   : > { %1974 = vsyncadd (%p2193_p11), %s460_s0, 4294965248  ;;  %s469_s5 = sand.u32 1, %s2110_s24   ;;  %s2274_s21 = scalar_lea.vmem [#allocation5], %s2262_s27 }
  0x5e   : > { %s470_s25 = scalar_lea.sflag [#allocation6], %s469_s5 }
  0x5f   : > { %1976 = dma.done.wait (%p2193_p11), %s470_s25, 2048  }
  0x60   : > { %1978 = vsyncadd (%p2193_p11), %s470_s25, 4294965248 }
  0x61   : > { %1980 = dma.done.wait (%p54_p1), [#allocation6], 2048  }
  0x62   : > { %1982 = vsyncadd (%p54_p1), [#allocation6], 4294965248 }
  0x63   : > { %1984 = dma.done.wait (%p54_p1), [#allocation9], 4096  }
  0x64   : > { %1986 = vsyncadd (%p54_p1), [#allocation9], 4294963200 }
  0x65   : > { %1988 = dma.done.wait (%p54_p1), [#allocation12], 4096  }
  0x66   : > { %1990 = vsyncadd (%p54_p1), [#allocation12], 4294963200 }
  0x67   : > { %1992 = dma.done.wait (%p54_p1), [#allocation15], 2048  }
  0x68   : > { %1994 = vsyncadd (%p54_p1), [#allocation15], 4294965248  ;;  %v614_v0 = vld [vmem:[#allocation8 + $0x78] sm:$0xff]  ;;  %v613_v2 = vld [vmem:[#allocation8 + $0x70] sm:$0xff]  ;;  %s2570_s26 = scalar_lea.vmem [#allocation16], %s2262_s27  ;;  %s1539_s6 = sshll.u32 %s2110_s24, 7 }
  0x69   : > { %v598_v1 = vld [vmem:[#allocation7 + $0x78] sm:$0xff]  ;;  %615 = vmatpush.xpose.msra.mxu0 %v614_v0  ;;  %v597_v3 = vld [vmem:[#allocation7 + $0x70] sm:$0xff]  ;;  %v596_v4 = vld [vmem:[#allocation7 + $0x68] sm:$0xff]  ;;  %s1318_s12 = scalar_lea.hbm %s2662_s11, %s1539_s6  ;;  %s1319_s7 = sshll.u32 %s2570_s26, 4  ;;  %s1320_s7 = int_to_ptr.vmem [resolvable:$true] %s1319_s7 }
  0x6a   : > { %680 = vmatpush.xpose.msra.mxu1 %v598_v1  ;;  %813 = vmatpush.msra.mxu2 %v598_v1  ;;  %v612_v5 = vld [vmem:[#allocation8 + $0x68] sm:$0xff]  ;;  %v595_v6 = vld [vmem:[#allocation7 + $0x60] sm:$0xff]  ;;  %v594_v7 = vld [vmem:[#allocation7 + $0x58] sm:$0xff]  ;;  %s1321_s3 = sshll.u32 %s1318_s12, 4  ;;  %s1307_s27 = scalar_lea.sflag [#allocation4], %s2259_s19  ;;  %s1322_s3 = int_to_ptr.hbm [resolvable:$true] %s1321_s3 }
  0x6b   : > { %v611_v8 = vld [vmem:[#allocation8 + $0x60] sm:$0xff]  ;;  %v593_v9 = vld [vmem:[#allocation7 + $0x50] sm:$0xff]  ;;  %v592_v10 = vld [vmem:[#allocation7 + $0x48] sm:$0xff]  ;;  %s1941_s24 = sshra.s32 %s1322_s3, 4  ;;  %s1947_s25 = scalar_lea.hbm %s2662_s11, 512  ;;  %s1942_s24 = int_to_ptr.hbm [resolvable:$true] %s1941_s24 }
  0x6c   : > { %814 = vmatpush.msra.mxu2 %v597_v3  ;;  %v610_v11 = vld [vmem:[#allocation8 + $0x58] sm:$0xff]  ;;  %v591_v12 = vld [vmem:[#allocation7 + $0x40] sm:$0xff]  ;;  %v609_v14 = vld [vmem:[#allocation8 + $0x50] sm:$0xff]  ;;  %s1943_s0 = scalar_lea.hbm %s1942_s24, 128  ;;  %p1948_p5 = scmp.lt.s32.totalorder %s1942_s24, %s2662_s11 }
  0x6d   : > { %616 = vmatpush.xpose.msra.mxu0 %v613_v2  ;;  %v590_v13 = vld [vmem:[#allocation7 + $0x38] sm:$0xff]  ;;  %v589_v15 = vld [vmem:[#allocation7 + $0x30] sm:$0xff]  ;;  %v588_v16 = vld [vmem:[#allocation7 + $0x28] sm:$0xff]  ;;  %p1944_p1 = scmp.ne.s32.totalorder %s1942_s24, %s1943_s0  ;;  %p1949_p7 = scmp.lt.s32.totalorder %s1947_s25, %s1943_s0 }
  0x6e   : > { %681 = vmatpush.xpose.msra.mxu1 %v597_v3  ;;  %815 = vmatpush.msra.mxu2 %v596_v4  ;;  %v608_v17 = vld [vmem:[#allocation8 + $0x48] sm:$0xff]  ;;  %v587_v18 = vld [vmem:[#allocation7 + $0x20] sm:$0xff]  ;;  %v586_v19 = vld [vmem:[#allocation7 + $0x18] sm:$0xff] }
  0x6f   : > { %v607_v20 = vld [vmem:[#allocation8 + $0x40] sm:$0xff]  ;;  %v585_v21 = vld [vmem:[#allocation7 + $0x10] sm:$0xff]  ;;  %v584_v22 = vld [vmem:[#allocation7 + $0x8] sm:$0xff]  ;;  %p1945_p3 = pnand %p1944_p1, %p2200_p2  ;;  %p1950_p6 = por %p1949_p7, %p1948_p5 }
  0x70   : > { %816 = vmatpush.msra.mxu2 %v595_v6  ;;  %v606_v23 = vld [vmem:[#allocation8 + $0x38] sm:$0xff]  ;;  %v583_v24 = vld [vmem:[#allocation7] sm:$0xff]  ;;  %v605_v25 = vld [vmem:[#allocation8 + $0x30] sm:$0xff] }
  0x71   : > { %617 = vmatpush.xpose.msra.mxu0 %v612_v5  ;;  %v604_v26 = vld [vmem:[#allocation8 + $0x28] sm:$0xff]  ;;  %v603_v27 = vld [vmem:[#allocation8 + $0x20] sm:$0xff]  ;;  %v602_v28 = vld [vmem:[#allocation8 + $0x18] sm:$0xff]  ;;  %p1946_p11 = pneg %p1945_p3 }
  0x72   : > { %682 = vmatpush.xpose.msra.mxu1 %v596_v4  ;;  %817 = vmatpush.msra.mxu2 %v594_v7  ;;  %v601_v29 = vld [vmem:[#allocation8 + $0x10] sm:$0xff]  ;;  %v600_v30 = vld [vmem:[#allocation8 + $0x8] sm:$0xff]  ;;  %v599_v31 = vld [vmem:[#allocation8] sm:$0xff] }
  0x73   : > { %v2297_v32 = vld [vmem:[%s2266_s13] sm:$0xff]  ;;  %v2305_v34 = vld [vmem:[%s2266_s13 + $0x8] sm:$0xff]  ;;  %v2313_v36 = vld [vmem:[%s2266_s13 + $0x10] sm:$0xff]  ;;  %p1951_p8 = pnand %p1950_p6, %p1946_p11 }
  0x74   : > { %818 = vmatpush.msra.mxu2 %v593_v9  ;;  %v2300_v33 = vld [vmem:[%s2274_s21] sm:$0xff]  ;;  %v2308_v35 = vld [vmem:[%s2274_s21 + $0x8] sm:$0xff]  ;;  %v2316_v37 = vld [vmem:[%s2274_s21 + $0x10] sm:$0xff] }
  0x75   : > { %618 = vmatpush.xpose.msra.mxu0 %v611_v8  ;;  %v2321_v38 = vld [vmem:[%s2266_s13 + $0x18] sm:$0xff]  ;;  %v2329_v40 = vld [vmem:[%s2266_s13 + $0x20] sm:$0xff]  ;;  %v2337_v42 = vld [vmem:[%s2266_s13 + $0x28] sm:$0xff] }
  0x76   : > { %683 = vmatpush.xpose.msra.mxu1 %v595_v6  ;;  %819 = vmatpush.msra.mxu2 %v592_v10  ;;  %v2324_v39 = vld [vmem:[%s2274_s21 + $0x18] sm:$0xff]  ;;  %v2332_v41 = vld [vmem:[%s2274_s21 + $0x20] sm:$0xff]  ;;  %v2340_v43 = vld [vmem:[%s2274_s21 + $0x28] sm:$0xff] }
  0x77   : > { %v2345_v44 = vld [vmem:[%s2266_s13 + $0x30] sm:$0xff]  ;;  %v2353_v46 = vld [vmem:[%s2266_s13 + $0x38] sm:$0xff]  ;;  %v2361_v48 = vld [vmem:[%s2266_s13 + $0x40] sm:$0xff] }
  0x78   : > { %820 = vmatpush.msra.mxu2 %v591_v12  ;;  %v2348_v45 = vld [vmem:[%s2274_s21 + $0x30] sm:$0xff]  ;;  %v2356_v47 = vld [vmem:[%s2274_s21 + $0x38] sm:$0xff]  ;;  %v2364_v49 = vld [vmem:[%s2274_s21 + $0x40] sm:$0xff] }
  0x79   : > { %619 = vmatpush.xpose.msra.mxu0 %v610_v11  ;;  %v2369_v50 = vld [vmem:[%s2266_s13 + $0x48] sm:$0xff]  ;;  %v925_v52 = vld [vmem:[#allocation11 + $0x78] sm:$0xff]  ;;  %v924_v53 = vld [vmem:[#allocation11 + $0x70] sm:$0xff] }
  0x7a   : > { %684 = vmatpush.xpose.msra.mxu1 %v594_v7  ;;  %821 = vmatpush.msra.mxu2 %v590_v13  ;;  %v2372_v51 = vld [vmem:[%s2274_s21 + $0x48] sm:$0xff]  ;;  %v2377_v55 = vld [vmem:[%s2266_s13 + $0x50] sm:$0xff]  ;;  %v922_v57 = vld [vmem:[#allocation11 + $0x60] sm:$0xff] }
  0x7b   : > { %926 = vmatpush.msra.mxu3 %v925_v52  ;;  %v923_v54 = vld [vmem:[#allocation11 + $0x68] sm:$0xff]  ;;  %v2380_v56 = vld [vmem:[%s2274_s21 + $0x50] sm:$0xff]  ;;  %v921_v58 = vld [vmem:[#allocation11 + $0x58] sm:$0xff] }
  0x7c   : > { %822 = vmatpush.msra.mxu2 %v589_v15  ;;  %v920_v59 = vld [vmem:[#allocation11 + $0x50] sm:$0xff]  ;;  %v919_v60 = vld [vmem:[#allocation11 + $0x48] sm:$0xff]  ;;  %v2385_v61 = vld [vmem:[%s2266_s13 + $0x58] sm:$0xff] }
  0x7d   : > { %620 = vmatpush.xpose.msra.mxu0 %v609_v14  ;;  %927 = vmatpush.msra.mxu3 %v924_v53  ;;  %v2388_v62 = vld [vmem:[%s2274_s21 + $0x58] sm:$0xff]  ;;  %v918_v63 = vld [vmem:[#allocation11 + $0x40] sm:$0xff]  ;;  %v916_v1 = vld [vmem:[#allocation11 + $0x30] sm:$0xff] }
  0x7e   : > { %685 = vmatpush.xpose.msra.mxu1 %v593_v9  ;;  %823 = vmatpush.msra.mxu2 %v588_v16  ;;  %v917_v0 = vld [vmem:[#allocation11 + $0x38] sm:$0xff]  ;;  %v2393_v2 = vld [vmem:[%s2266_s13 + $0x60] sm:$0xff]  ;;  %v915_v4 = vld [vmem:[#allocation11 + $0x28] sm:$0xff] }
  0x7f   : > { %928 = vmatpush.msra.mxu3 %v923_v54  ;;  %v2396_v3 = vld [vmem:[%s2274_s21 + $0x60] sm:$0xff]  ;;  %v913_v6 = vld [vmem:[#allocation11 + $0x18] sm:$0xff]  ;;  %v912_v7 = vld [vmem:[#allocation11 + $0x10] sm:$0xff] }
  0x80   : > { %824 = vmatpush.msra.mxu2 %v587_v18  ;;  %v914_v5 = vld [vmem:[#allocation11 + $0x20] sm:$0xff]  ;;  %v2401_v8 = vld [vmem:[%s2266_s13 + $0x68] sm:$0xff]  ;;  %v909_v11 = vld [vmem:[#allocation10 + $0x78] sm:$0xff] }
  0x81   : > { %621 = vmatpush.xpose.msra.mxu0 %v608_v17  ;;  %929 = vmatpush.msra.mxu3 %v922_v57  ;;  %v2404_v9 = vld [vmem:[%s2274_s21 + $0x68] sm:$0xff]  ;;  %v2410_v14 = vld [vmem:[%s2266_s13 + $0x70] sm:$0xff] }
  0x82   : > { %686 = vmatpush.xpose.msra.mxu1 %v592_v10  ;;  %825 = vmatpush.msra.mxu2 %v586_v19  ;;  %v911_v10 = vld [vmem:[#allocation11 + $0x8] sm:$0xff]  ;;  %v1070_v17 = vld [vmem:[#allocation13 + $0x70] sm:$0xff] }
  0x83   : > { %930 = vmatpush.msra.mxu3 %v921_v58  ;;  %v904_v57 = vld [vmem:[#allocation10 + $0x50] sm:$0xff] }
  0x84   : > { %826 = vmatpush.msra.mxu2 %v585_v21  ;;  %v1066_v58 = vld [vmem:[#allocation13 + $0x50] sm:$0xff] }
  0x85   : > { %622 = vmatpush.xpose.msra.mxu0 %v607_v20  ;;  %931 = vmatpush.msra.mxu3 %v920_v59  ;;  %v907_v20 = vld [vmem:[#allocation10 + $0x68] sm:$0xff] }
  0x86   : > { %687 = vmatpush.xpose.msra.mxu1 %v591_v12  ;;  %827 = vmatpush.msra.mxu2 %v584_v22  ;;  %v910_v12 = vld [vmem:[#allocation11] sm:$0xff] }
  0x87   : > { %932 = vmatpush.msra.mxu3 %v919_v60 }
  0x88   : > { %828 = vmatpush.msra.mxu2 %v583_v24 }
  0x89   : > { %623 = vmatpush.xpose.msra.mxu0 %v606_v23  ;;  %933 = vmatpush.msra.mxu3 %v918_v63 }
  0x8a   : > { %688 = vmatpush.xpose.msra.mxu1 %v590_v13  ;;  %991 = vmatpush.msrb.mxu2 %v909_v11  ;;  %v1071_v13 = vld [vmem:[#allocation13 + $0x78] sm:$0xff] }
  0x8b   : > { %934 = vmatpush.msra.mxu3 %v917_v0 }
  0x8d   : > { %624 = vmatpush.xpose.msra.mxu0 %v605_v25  ;;  %935 = vmatpush.msra.mxu3 %v916_v1  ;;  %v1065_v1 = vld [vmem:[#allocation13 + $0x48] sm:$0xff] }
  0x8e   : > { %689 = vmatpush.xpose.msra.mxu1 %v589_v15  ;;  %v2413_v15 = vld [vmem:[%s2274_s21 + $0x70] sm:$0xff] }
  0x8f   : > { %936 = vmatpush.msra.mxu3 %v915_v4 }
  0x91   : > { %625 = vmatpush.xpose.msra.mxu0 %v604_v26  ;;  %937 = vmatpush.msra.mxu3 %v914_v5  ;;  %v906_v26 = vld [vmem:[#allocation10 + $0x60] sm:$0xff] }
  0x92   : > { %690 = vmatpush.xpose.msra.mxu1 %v588_v16  ;;  %v908_v16 = vld [vmem:[#allocation10 + $0x70] sm:$0xff] }
  0x93   : > { %938 = vmatpush.msra.mxu3 %v913_v6  ;;  %992 = vmatpush.msrb.mxu2 %v908_v16 }
  0x95   : > { %626 = vmatpush.xpose.msra.mxu0 %v603_v27  ;;  %939 = vmatpush.msra.mxu3 %v912_v7  ;;  %v1068_v27 = vld [vmem:[#allocation13 + $0x60] sm:$0xff] }
  0x96   : > { %691 = vmatpush.xpose.msra.mxu1 %v587_v18  ;;  %v2419_v18 = vld [vmem:[%s2266_s13 + $0x78] sm:$0xff]  ;;  %993 = vmatpush.msrb.mxu2 %v907_v20 }
  0x97   : > { %940 = vmatpush.msra.mxu3 %v911_v10  ;;  %v1064_v10 = vld [vmem:[#allocation13 + $0x40] sm:$0xff] }
  0x98   : > { %994 = vmatpush.msrb.mxu2 %v906_v26 }
  0x99   : > { %627 = vmatpush.xpose.msra.mxu0 %v602_v28  ;;  %941 = vmatpush.msra.mxu3 %v910_v12 }
  0x9a   : > { %692 = vmatpush.xpose.msra.mxu1 %v586_v19  ;;  %942 = vmatmul.f32.vlgmr.msra.gmra.mxu3 %v2300_v33  ;;  %v2422_v19 = vld [vmem:[%s2274_s21 + $0x78] sm:$0xff] }
  0x9b   : > { %1072 = vmatpush.msrb.mxu3 %v1071_v13 }
  0x9d   : > { %628 = vmatpush.xpose.msra.mxu0 %v601_v29  ;;  %1073 = vmatpush.msrb.mxu3 %v1070_v17  ;;  %v2023_v29 = vmov 1.0   ;;  %v1063_v17 = vld [vmem:[#allocation13 + $0x38] sm:$0xff] }
  0x9e   : > { %693 = vmatpush.xpose.msra.mxu1 %v585_v21  ;;  %v1069_v21 = vld [vmem:[#allocation13 + $0x68] sm:$0xff] }
  0x9f   : > { %1074 = vmatpush.msrb.mxu3 %v1069_v21 }
  0xa1   : > { %629 = vmatpush.xpose.msra.mxu0 %v600_v30  ;;  %1075 = vmatpush.msrb.mxu3 %v1068_v27 }
  0xa2   : > { %694 = vmatpush.xpose.msra.mxu1 %v584_v22  ;;  %945 = vmatmul.f32.gmra.mxu3 %v2308_v35  ;;  %v2430_v22 = vld [vmem:[%s2655_s4] ss:$0 sm:$0xff] }
  0xa5   : > { %630 = vmatpush.xpose.msra.mxu0 %v599_v31 }
  0xa6   : > { %695 = vmatpush.xpose.msra.mxu1 %v583_v24 }
  0xa8   : > { %631 = vmatmul.f32.vlgmr.msra.gmra.mxu0 %v2297_v32 }
  0xa9   : > { %696 = vmatmul.f32.vlgmr.msra.gmra.mxu1 %v2300_v33 }
  0xaa   : > { %948 = vmatmul.f32.gmra.mxu3 %v2316_v37 }
  0xb0   : > { %634 = vmatmul.f32.gmra.mxu0 %v2305_v34 }
  0xb1   : > { %699 = vmatmul.f32.gmra.mxu1 %v2308_v35  ;;  %v905_v35 = vld [vmem:[#allocation10 + $0x58] sm:$0xff] }
  0xb2   : > { %951 = vmatmul.f32.gmra.mxu3 %v2324_v39  ;;  %995 = vmatpush.msrb.mxu2 %v905_v35 }
  0xb4   : > { %996 = vmatpush.msrb.mxu2 %v904_v57 }
  0xb8   : > { %637 = vmatmul.f32.gmra.mxu0 %v2313_v36 }
  0xb9   : > { %702 = vmatmul.f32.gmra.mxu1 %v2316_v37  ;;  %v1067_v37 = vld [vmem:[#allocation13 + $0x58] sm:$0xff] }
  0xba   : > { %1076 = vmatpush.msrb.mxu3 %v1067_v37 }
  0xbb   : > { %954 = vmatmul.f32.gmra.mxu3 %v2332_v41 }
  0xbc   : > { %1077 = vmatpush.msrb.mxu3 %v1066_v58 }
  0xbe   : > { %1078 = vmatpush.msrb.mxu3 %v1065_v1  ;;  %v896_v1 = vld [vmem:[#allocation10 + $0x10] sm:$0xff] }
  0xc0   : > { %640 = vmatmul.f32.gmra.mxu0 %v2321_v38  ;;  %1079 = vmatpush.msrb.mxu3 %v1064_v10  ;;  %v895_v10 = vld [vmem:[#allocation10 + $0x8] sm:$0xff] }
  0xc1   : > { %705 = vmatmul.f32.gmra.mxu1 %v2324_v39 }
  0xc2   : > { %1080 = vmatpush.msrb.mxu3 %v1063_v17 }
  0xc3   : > { %957 = vmatmul.f32.gmra.mxu3 %v2340_v43 }
  0xc8   : > { %643 = vmatmul.f32.gmra.mxu0 %v2329_v40 }
  0xc9   : > { %708 = vmatmul.f32.gmra.mxu1 %v2332_v41  ;;  %v903_v41 = vld [vmem:[#allocation10 + $0x48] sm:$0xff] }
  0xca   : > { %997 = vmatpush.msrb.mxu2 %v903_v41 }
  0xcb   : > { %960 = vmatmul.f32.gmra.mxu3 %v2348_v45 }
  0xd0   : > { %646 = vmatmul.f32.gmra.mxu0 %v2337_v42 }
  0xd1   : > { %711 = vmatmul.f32.gmra.mxu1 %v2340_v43  ;;  %v902_v43 = vld [vmem:[#allocation10 + $0x40] sm:$0xff] }
  0xd2   : > { %998 = vmatpush.msrb.mxu2 %v902_v43 }
  0xd3   : > { %963 = vmatmul.f32.gmra.mxu3 %v2356_v47 }
  0xd8   : > { %649 = vmatmul.f32.gmra.mxu0 %v2345_v44 }
  0xd9   : > { %714 = vmatmul.f32.gmra.mxu1 %v2348_v45  ;;  %v901_v45 = vld [vmem:[#allocation10 + $0x38] sm:$0xff] }
  0xda   : > { %999 = vmatpush.msrb.mxu2 %v901_v45 }
  0xdb   : > { %966 = vmatmul.f32.gmra.mxu3 %v2364_v49 }
  0xe0   : > { %652 = vmatmul.f32.gmra.mxu0 %v2353_v46 }
  0xe1   : > { %717 = vmatmul.f32.gmra.mxu1 %v2356_v47  ;;  %v900_v47 = vld [vmem:[#allocation10 + $0x30] sm:$0xff] }
  0xe2   : > { %1000 = vmatpush.msrb.mxu2 %v900_v47 }
  0xe3   : > { %969 = vmatmul.f32.gmra.mxu3 %v2372_v51 }
  0xe8   : > { %655 = vmatmul.f32.gmra.mxu0 %v2361_v48 }
  0xe9   : > { %720 = vmatmul.f32.gmra.mxu1 %v2364_v49  ;;  %v899_v49 = vld [vmem:[#allocation10 + $0x28] sm:$0xff] }
  0xea   : > { %1001 = vmatpush.msrb.mxu2 %v899_v49 }
  0xeb   : > { %972 = vmatmul.f32.gmra.mxu3 %v2380_v56 }
  0xf0   : > { %658 = vmatmul.f32.gmra.mxu0 %v2369_v50 }
  0xf1   : > { %723 = vmatmul.f32.gmra.mxu1 %v2372_v51  ;;  %v898_v51 = vld [vmem:[#allocation10 + $0x20] sm:$0xff] }
  0xf2   : > { %1002 = vmatpush.msrb.mxu2 %v898_v51 }
  0xf3   : > { %975 = vmatmul.f32.gmra.mxu3 %v2388_v62 }
  0xf8   : > { %661 = vmatmul.f32.gmra.mxu0 %v2377_v55 }
  0xf9   : > { %726 = vmatmul.f32.gmra.mxu1 %v2380_v56  ;;  %v897_v56 = vld [vmem:[#allocation10 + $0x18] sm:$0xff] }
  0xfa   : > { %1003 = vmatpush.msrb.mxu2 %v897_v56 }
  0xfb   : > { %978 = vmatmul.f32.gmra.mxu3 %v2396_v3 }
  0xfc   : > { %1004 = vmatpush.msrb.mxu2 %v896_v1 }
  0xfe   : > { %1005 = vmatpush.msrb.mxu2 %v895_v10 }
 0x100   : > { %664 = vmatmul.f32.gmra.mxu0 %v2385_v61 }
 0x101   : > { %729 = vmatmul.f32.gmra.mxu1 %v2388_v62 }
 0x103   : > { %981 = vmatmul.f32.gmra.mxu3 %v2404_v9 }
 0x108   : > { %667 = vmatmul.f32.gmra.mxu0 %v2393_v2 }
 0x109   : > { %732 = vmatmul.f32.gmra.mxu1 %v2396_v3 }
 0x10b   : > { %984 = vmatmul.f32.gmra.mxu3 %v2413_v15 }
 0x110   : > { %670 = vmatmul.f32.gmra.mxu0 %v2401_v8 }
 0x111   : > { %735 = vmatmul.f32.gmra.mxu1 %v2404_v9 }
 0x113   : > { %987 = vmatmul.f32.gmra.mxu3 %v2422_v19 }
 0x118   : > { %673 = vmatmul.f32.gmra.mxu0 %v2410_v14 }
 0x119   : > { %738 = vmatmul.f32.gmra.mxu1 %v2413_v15 }
 0x120   : > { %676 = vmatmul.f32.gmra.mxu0 %v2419_v18 }
 0x121   : > { %741 = vmatmul.f32.gmra.mxu1 %v2422_v19 }
 0x125   : > { %v632_v23 = vpop.f32.mrf.mxu0 }
 0x126   : > { %v697_v24 = vpop.f32.mrf.mxu1 }
 0x127   : > { %v698_v25 = vadd.f32 %v697_v24, %v632_v23 }
 0x129   : > { %v749_v28 = vsub.f32 %v698_v25, %v2430_v22  ;;  %v1062_v25 = vld [vmem:[#allocation13 + $0x30] sm:$0xff] }
 0x12a   : > { %1081 = vmatpush.msrb.mxu3 %v1062_v25 }
 0x12b   : > { %vm765_vm0 = vcmp.gt.f32.partialorder %v749_v28, 0.0 }
 0x12c   : > { %1516 = vmatmul.msk.f32.vlgmr.msra.gmra.mxu2 %vm765_vm0, %v2023_v29 }
 0x12d   : > { %v635_v30 = vpop.f32.mrf.mxu0 }
 0x12e   : > { %v700_v31 = vpop.f32.mrf.mxu1 }
 0x12f   : > { %v701_v33 = vadd.f32 %v700_v31, %v635_v30  ;;  %v1061_v31 = vld [vmem:[#allocation13 + $0x28] sm:$0xff] }
 0x130   : > { %1082 = vmatpush.msrb.mxu3 %v1061_v31 }
 0x131   : > { %v750_v52 = vsub.f32 %v701_v33, %v2430_v22 }
 0x133   : > { %vm766_vm1 = vcmp.gt.f32.partialorder %v750_v52, 0.0 }
 0x134   : > { %1517 = vmatmul.msk.f32.gmra.mxu2 %vm766_vm1, %v2023_v29 }
 0x135   : > { %v638_v53 = vpop.f32.mrf.mxu0 }
 0x136   : > { %v703_v54 = vpop.f32.mrf.mxu1 }
 0x137   : > { %v704_v39 = vadd.f32 %v703_v54, %v638_v53  ;;  %v1060_v53 = vld [vmem:[#allocation13 + $0x20] sm:$0xff] }
 0x138   : > { %1083 = vmatpush.msrb.mxu3 %v1060_v53 }
 0x139   : > { %v751_v59 = vsub.f32 %v704_v39, %v2430_v22 }
 0x13b   : > { %vm767_vm2 = vcmp.gt.f32.partialorder %v751_v59, 0.0  ;;  %v1059_v59 = vld [vmem:[#allocation13 + $0x18] sm:$0xff] }
 0x13c   : > { %1518 = vmatmul.msk.f32.gmra.mxu2 %vm767_vm2, %v2023_v29  ;;  %1084 = vmatpush.msrb.mxu3 %v1059_v59 }
 0x13d   : > { %v641_v60 = vpop.f32.mrf.mxu0 }
 0x13e   : > { %v706_v63 = vpop.f32.mrf.mxu1 }
 0x13f   : > { %v707_v0 = vadd.f32 %v706_v63, %v641_v60 }
 0x141   : > { %v752_v4 = vsub.f32 %v707_v0, %v2430_v22 }
 0x143   : > { %vm768_vm3 = vcmp.gt.f32.partialorder %v752_v4, 0.0  ;;  %v1058_v4 = vld [vmem:[#allocation13 + $0x10] sm:$0xff] }
 0x144   : > { %1519 = vmatmul.msk.f32.gmra.mxu2 %vm768_vm3, %v2023_v29  ;;  %1085 = vmatpush.msrb.mxu3 %v1058_v4 }
 0x145   : > { %v644_v5 = vpop.f32.mrf.mxu0 }
 0x146   : > { %v709_v6 = vpop.f32.mrf.mxu1 }
 0x147   : > { %v710_v7 = vadd.f32 %v709_v6, %v644_v5 }
 0x149   : > { %v753_v11 = vsub.f32 %v710_v7, %v2430_v22 }
 0x14b   : > { %vm769_vm4 = vcmp.gt.f32.partialorder %v753_v11, 0.0  ;;  %v1057_v11 = vld [vmem:[#allocation13 + $0x8] sm:$0xff] }
 0x14c   : > { %1520 = vmatmul.msk.f32.gmra.mxu2 %vm769_vm4, %v2023_v29  ;;  %1086 = vmatpush.msrb.mxu3 %v1057_v11  ;;  %v1200_v11 = vld [vmem:[#allocation14 + $0x58] sm:$0xff] }
 0x14d   : > { %v647_v12 = vpop.f32.mrf.mxu0 }
 0x14e   : > { %v712_v13 = vpop.f32.mrf.mxu1 }
 0x14f   : > { %v713_v16 = vadd.f32 %v712_v13, %v647_v12  ;;  %v894_v13 = vld [vmem:[#allocation10] sm:$0xff] }
 0x150   : > { %1006 = vmatpush.msrb.mxu2 %v894_v13 }
 0x151   : > { %v754_v20 = vsub.f32 %v713_v16, %v2430_v22  ;;  %v1056_v16 = vld [vmem:[#allocation13] sm:$0xff] }
 0x152   : > { %1087 = vmatpush.msrb.mxu3 %v1056_v16 }
 0x153   : > { %vm770_vm5 = vcmp.gt.f32.partialorder %v754_v20, 0.0 }
 0x154   : > { %1521 = vmatmul.msk.f32.gmra.mxu2 %vm770_vm5, %v2023_v29 }
 0x155   : > { %v650_v21 = vpop.f32.mrf.mxu0 }
 0x156   : > { %v715_v23 = vpop.f32.mrf.mxu1 }
 0x157   : > { %v716_v24 = vadd.f32 %v715_v23, %v650_v21 }
 0x159   : > { %v755_v26 = vsub.f32 %v716_v24, %v2430_v22 }
 0x15b   : > { %vm771_vm6 = vcmp.gt.f32.partialorder %v755_v26, 0.0 }
 0x15c   : > { %1522 = vmatmul.msk.f32.gmra.mxu2 %vm771_vm6, %v2023_v29 }
 0x15d   : > { %v653_v27 = vpop.f32.mrf.mxu0 }
 0x15e   : > { %v718_v28 = vpop.f32.mrf.mxu1 }
 0x15f   : > { %v719_v30 = vadd.f32 %v718_v28, %v653_v27 }
 0x161   : > { %v756_v33 = vsub.f32 %v719_v30, %v2430_v22  ;;  %v2473_v30 = vpop.f32.mrf.mxu3 }
 0x163   : > { %vm772_vm7 = vcmp.gt.f32.partialorder %v756_v33, 0.0 }
 0x164   : > { %1523 = vmatmul.msk.f32.gmra.mxu2 %vm772_vm7, %v2023_v29 }
 0x165   : > { %v656_v35 = vpop.f32.mrf.mxu0 }
 0x166   : > { %v721_v37 = vpop.f32.mrf.mxu1 }
 0x167   : > { %v722_v52 = vadd.f32 %v721_v37, %v656_v35 }
 0x169   : > { %v757_v54 = vsub.f32 %v722_v52, %v2430_v22  ;;  %v2477_v37 = vpop.f32.mrf.mxu3 }
 0x16b   : > { %vm773_vm8 = vcmp.gt.f32.partialorder %v757_v54, 0.0 }
 0x16c   : > { %1524 = vmatmul.msk.f32.gmra.mxu2 %vm773_vm8, %v2023_v29 }
 0x16d   : > { %v659_v39 = vpop.f32.mrf.mxu0 }
 0x16e   : > { %v724_v57 = vpop.f32.mrf.mxu1 }
 0x16f   : > { %v725_v58 = vadd.f32 %v724_v57, %v659_v39 }
 0x171   : > { %v758_v60 = vsub.f32 %v725_v58, %v2430_v22  ;;  %v2481_v51 = vpop.f32.mrf.mxu3 }
 0x173   : > { %vm774_vm9 = vcmp.gt.f32.partialorder %v758_v60, 0.0 }
 0x174   : > { %1525 = vmatmul.msk.f32.gmra.mxu2 %vm774_vm9, %v2023_v29 }
 0x175   : > { %v662_v63 = vpop.f32.mrf.mxu0 }
 0x176   : > { %v727_v0 = vpop.f32.mrf.mxu1 }
 0x177   : > { %v728_v41 = vadd.f32 %v727_v0, %v662_v63 }
 0x179   : > { %v759_v5 = vsub.f32 %v728_v41, %v2430_v22  ;;  %v2484_v39 = vpop.f32.mrf.mxu3  ;;  %v1203_v41 = vld [vmem:[#allocation14 + $0x70] sm:$0xff] }
 0x17b   : > { %vm775_vm10 = vcmp.gt.f32.partialorder %v759_v5, 0.0 }
 0x17c   : > { %1526 = vmatmul.msk.f32.gmra.mxu2 %vm775_vm10, %v2023_v29 }
 0x17d   : > { %v665_v6 = vpop.f32.mrf.mxu0 }
 0x17e   : > { %v730_v7 = vpop.f32.mrf.mxu1 }
 0x17f   : > { %v731_v43 = vadd.f32 %v730_v7, %v665_v6  ;;  %v1201_v7 = vld [vmem:[#allocation14 + $0x60] sm:$0xff] }
 0x181   : > { %v760_v12 = vsub.f32 %v731_v43, %v2430_v22 }
 0x183   : > { %vm776_vm11 = vcmp.gt.f32.partialorder %v760_v12, 0.0 }
 0x184   : > { %1527 = vmatmul.msk.f32.gmra.mxu2 %vm776_vm11, %v2023_v29 }
 0x185   : > { %v668_v45 = vpop.f32.mrf.mxu0 }
 0x186   : > { %v733_v17 = vpop.f32.mrf.mxu1 }
 0x187   : > { %v734_v20 = vadd.f32 %v733_v17, %v668_v45 }
 0x189   : > { %v761_v21 = vsub.f32 %v734_v20, %v2430_v22 }
 0x18b   : > { %vm777_vm12 = vcmp.gt.f32.partialorder %v761_v21, 0.0 }
 0x18c   : > { %1528 = vmatmul.msk.f32.gmra.mxu2 %vm777_vm12, %v2023_v29 }
 0x18d   : > { %v671_v23 = vpop.f32.mrf.mxu0 }
 0x18e   : > { %v736_v24 = vpop.f32.mrf.mxu1 }
 0x18f   : > { %v737_v47 = vadd.f32 %v736_v24, %v671_v23 }
 0x191   : > { %v762_v25 = vsub.f32 %v737_v47, %v2430_v22 }
 0x193   : > { %vm778_vm13 = vcmp.gt.f32.partialorder %v762_v25, 0.0  ;;  %v1196_v25 = vld [vmem:[#allocation14 + $0x38] sm:$0xff] }
 0x194   : > { %1529 = vmatmul.msk.f32.gmra.mxu2 %vm778_vm13, %v2023_v29 }
 0x195   : > { %v674_v26 = vpop.f32.mrf.mxu0 }
 0x196   : > { %v739_v27 = vpop.f32.mrf.mxu1 }
 0x197   : > { %v740_v28 = vadd.f32 %v739_v27, %v674_v26  ;;  %v1195_v26 = vld [vmem:[#allocation14 + $0x30] sm:$0xff] }
 0x199   : > { %v763_v49 = vsub.f32 %v740_v28, %v2430_v22 }
 0x19b   : > { %vm779_vm14 = vcmp.gt.f32.partialorder %v763_v49, 0.0  ;;  %v1194_v49 = vld [vmem:[#allocation14 + $0x28] sm:$0xff] }
 0x19c   : > { %1530 = vmatmul.msk.f32.gmra.mxu2 %vm779_vm14, %v2023_v29 }
 0x19d   : > { %v677_v31 = vpop.f32.mrf.mxu0 }
 0x19e   : > { %v742_v33 = vpop.f32.mrf.mxu1 }
 0x19f   : > { %v743_v35 = vadd.f32 %v742_v33, %v677_v31  ;;  %v1192_v31 = vld [vmem:[#allocation14 + $0x18] sm:$0xff] }
 0x1a1   : > { %v764_v52 = vsub.f32 %v743_v35, %v2430_v22  ;;  %v2488_v22 = vpop.f32.mrf.mxu3 }
 0x1a3   : > { %vm780_vm15 = vcmp.gt.f32.partialorder %v764_v52, 0.0 }
 0x1a4   : > { %1531 = vmatmul.msk.f32.gmra.mxu2 %vm780_vm15, %v2023_v29 }
 0x1a9   : > { %v2491_v59 = vpop.f32.mrf.mxu3 }
 0x1ac   : > { %1007 = vmatmul.f32.vlgmr.msrb.gmra.mxu2 %v2297_v32 }
 0x1af   : > { %v830_v53 = vpop.f32.mrf.mxu2 }
 0x1b0   : > { %v878_v54 = vmul.f32 0.03125, %v830_v53  ;;  %v1190_v53 = vld [vmem:[#allocation14 + $0x8] sm:$0xff] }
 0x1b2   : > { %1088 = vmatmul.f32.vlgmr.msrb.gmra.mxu3 %v878_v54  ;;  %v1189_v54 = vld [vmem:[#allocation14] sm:$0xff] }
 0x1b4   : > { %1010 = vmatmul.f32.gmra.mxu2 %v2305_v34  ;;  %v1204_v34 = vld [vmem:[#allocation14 + $0x78] sm:$0xff] }
 0x1b5   : > { %1209 = vmatpush.msrb.mxu0 %v1204_v34  ;;  %1540 = vmatpush.msrb.mxu1 %v1204_v34 }
 0x1b7   : > { %v833_v57 = vpop.f32.mrf.mxu2  ;;  %1210 = vmatpush.msrb.mxu0 %v1203_v41  ;;  %1541 = vmatpush.msrb.mxu1 %v1203_v41 }
 0x1b8   : > { %v879_v58 = vmul.f32 0.03125, %v833_v57 }
 0x1ba   : > { %1091 = vmatmul.f32.gmra.mxu3 %v879_v58 }
 0x1bc   : > { %1013 = vmatmul.f32.gmra.mxu2 %v2313_v36  ;;  %v2494_v36 = vpop.f32.mrf.mxu3 }
 0x1bf   : > { %v836_v56 = vpop.f32.mrf.mxu2 }
 0x1c0   : > { %v880_v29 = vmul.f32 0.03125, %v836_v56 }
 0x1c2   : > { %1094 = vmatmul.f32.gmra.mxu3 %v880_v29 }
 0x1c4   : > { %1016 = vmatmul.f32.gmra.mxu2 %v2321_v38  ;;  %v2497_v4 = vpop.f32.mrf.mxu3 }
 0x1c7   : > { %v839_v32 = vpop.f32.mrf.mxu2 }
 0x1c8   : > { %v881_v60 = vmul.f32 0.03125, %v839_v32 }
 0x1ca   : > { %1097 = vmatmul.f32.gmra.mxu3 %v881_v60 }
 0x1cc   : > { %1019 = vmatmul.f32.gmra.mxu2 %v2329_v40  ;;  %v1202_v40 = vld [vmem:[#allocation14 + $0x68] sm:$0xff] }
 0x1cd   : > { %1211 = vmatpush.msrb.mxu0 %v1202_v40  ;;  %1542 = vmatpush.msrb.mxu1 %v1202_v40 }
 0x1cf   : > { %v842_v63 = vpop.f32.mrf.mxu2  ;;  %1212 = vmatpush.msrb.mxu0 %v1201_v7  ;;  %1543 = vmatpush.msrb.mxu1 %v1201_v7 }
 0x1d0   : > { %v882_v0 = vmul.f32 0.03125, %v842_v63  ;;  %v2529_v63 = vld [vmem:[%s2659_s8] ss:$0 sm:$0xff] }
 0x1d1   : > { %1213 = vmatpush.msrb.mxu0 %v1200_v11  ;;  %1544 = vmatpush.msrb.mxu1 %v1200_v11 }
 0x1d2   : > { %1100 = vmatmul.f32.gmra.mxu3 %v882_v0 }
 0x1d4   : > { %1022 = vmatmul.f32.gmra.mxu2 %v2337_v42  ;;  %v2501_v42 = vpop.f32.mrf.mxu3 }
 0x1d7   : > { %v845_v38 = vpop.f32.mrf.mxu2 }
 0x1d8   : > { %v883_v1 = vmul.f32 0.03125, %v845_v38 }
 0x1da   : > { %1103 = vmatmul.f32.gmra.mxu3 %v883_v1 }
 0x1dc   : > { %1025 = vmatmul.f32.gmra.mxu2 %v2345_v44  ;;  %v2504_v12 = vpop.f32.mrf.mxu3 }
 0x1df   : > { %v848_v5 = vpop.f32.mrf.mxu2 }
 0x1e0   : > { %v884_v6 = vmul.f32 0.03125, %v848_v5 }
 0x1e2   : > { %1106 = vmatmul.f32.gmra.mxu3 %v884_v6 }
 0x1e4   : > { %1028 = vmatmul.f32.gmra.mxu2 %v2353_v46  ;;  %v1199_v46 = vld [vmem:[#allocation14 + $0x50] sm:$0xff]  ;;  %v2507_v17 = vpop.f32.mrf.mxu3 }
 0x1e5   : > { %1214 = vmatpush.msrb.mxu0 %v1199_v46  ;;  %1545 = vmatpush.msrb.mxu1 %v1199_v46 }
 0x1e7   : > { %v851_v43 = vpop.f32.mrf.mxu2 }
 0x1e8   : > { %v885_v10 = vmul.f32 0.03125, %v851_v43 }
 0x1ea   : > { %1109 = vmatmul.f32.gmra.mxu3 %v885_v10 }
 0x1ec   : > { %1031 = vmatmul.f32.gmra.mxu2 %v2361_v48  ;;  %v1198_v48 = vld [vmem:[#allocation14 + $0x48] sm:$0xff]  ;;  %v2510_v23 = vpop.f32.mrf.mxu3 }
 0x1ed   : > { %1215 = vmatpush.msrb.mxu0 %v1198_v48  ;;  %1546 = vmatpush.msrb.mxu1 %v1198_v48 }
 0x1ef   : > { %v854_v44 = vpop.f32.mrf.mxu2 }
 0x1f0   : > { %v886_v13 = vmul.f32 0.03125, %v854_v44 }
 0x1f2   : > { %1112 = vmatmul.f32.gmra.mxu3 %v886_v13 }
 0x1f4   : > { %1034 = vmatmul.f32.gmra.mxu2 %v2369_v50  ;;  %v1197_v50 = vld [vmem:[#allocation14 + $0x40] sm:$0xff] }
 0x1f5   : > { %1216 = vmatpush.msrb.mxu0 %v1197_v50  ;;  %1547 = vmatpush.msrb.mxu1 %v1197_v50 }
 0x1f7   : > { %v857_v16 = vpop.f32.mrf.mxu2  ;;  %1217 = vmatpush.msrb.mxu0 %v1196_v25  ;;  %1548 = vmatpush.msrb.mxu1 %v1196_v25 }
 0x1f8   : > { %v887_v45 = vmul.f32 0.03125, %v857_v16 }
 0x1f9   : > { %1218 = vmatpush.msrb.mxu0 %v1195_v26  ;;  %1549 = vmatpush.msrb.mxu1 %v1195_v26 }
 0x1fa   : > { %1115 = vmatmul.f32.gmra.mxu3 %v887_v45 }
 0x1fb   : > { %1219 = vmatpush.msrb.mxu0 %v1194_v49  ;;  %1550 = vmatpush.msrb.mxu1 %v1194_v49 }
 0x1fc   : > { %1037 = vmatmul.f32.gmra.mxu2 %v2377_v55  ;;  %v2514_v55 = vpop.f32.mrf.mxu3 }
 0x1ff   : > { %v860_v20 = vpop.f32.mrf.mxu2 }
 0x200   : > { %v888_v21 = vmul.f32 0.03125, %v860_v20 }
 0x202   : > { %1118 = vmatmul.f32.gmra.mxu3 %v888_v21 }
 0x204   : > { %1040 = vmatmul.f32.gmra.mxu2 %v2385_v61  ;;  %v1193_v61 = vld [vmem:[#allocation14 + $0x20] sm:$0xff]  ;;  %v2517_v35 = vpop.f32.mrf.mxu3 }
 0x205   : > { %1220 = vmatpush.msrb.mxu0 %v1193_v61  ;;  %1551 = vmatpush.msrb.mxu1 %v1193_v61 }
 0x207   : > { %v863_v24 = vpop.f32.mrf.mxu2  ;;  %1221 = vmatpush.msrb.mxu0 %v1192_v31  ;;  %1552 = vmatpush.msrb.mxu1 %v1192_v31 }
 0x208   : > { %v889_v47 = vmul.f32 0.03125, %v863_v24 }
 0x20a   : > { %1121 = vmatmul.f32.gmra.mxu3 %v889_v47 }
 0x20c   : > { %1043 = vmatmul.f32.gmra.mxu2 %v2393_v2  ;;  %v1191_v2 = vld [vmem:[#allocation14 + $0x10] sm:$0xff]  ;;  %v2520_v58 = vpop.f32.mrf.mxu3 }
 0x20d   : > { %1222 = vmatpush.msrb.mxu0 %v1191_v2  ;;  %1553 = vmatpush.msrb.mxu1 %v1191_v2 }
 0x20f   : > { %v866_v27 = vpop.f32.mrf.mxu2  ;;  %1223 = vmatpush.msrb.mxu0 %v1190_v53  ;;  %1554 = vmatpush.msrb.mxu1 %v1190_v53 }
 0x210   : > { %v890_v28 = vmul.f32 0.03125, %v866_v27 }
 0x211   : > { %1224 = vmatpush.msrb.mxu0 %v1189_v54  ;;  %1555 = vmatpush.msrb.mxu1 %v1189_v54 }
 0x212   : > { %1124 = vmatmul.f32.gmra.mxu3 %v890_v28 }
 0x214   : > { %1046 = vmatmul.f32.gmra.mxu2 %v2401_v8  ;;  %v2523_v32 = vpop.f32.mrf.mxu3 }
 0x217   : > { %v869_v33 = vpop.f32.mrf.mxu2 }
 0x218   : > { %v891_v52 = vmul.f32 0.03125, %v869_v33 }
 0x21a   : > { %1127 = vmatmul.f32.gmra.mxu3 %v891_v52 }
 0x21c   : > { %1049 = vmatmul.f32.gmra.mxu2 %v2410_v14 }
 0x21f   : > { %v872_v8 = vpop.f32.mrf.mxu2 }
 0x220   : > { %v892_v57 = vmul.f32 0.03125, %v872_v8 }
 0x222   : > { %1130 = vmatmul.f32.gmra.mxu3 %v892_v57 }
 0x224   : > { %1052 = vmatmul.f32.gmra.mxu2 %v2419_v18 }
 0x227   : > { %v875_v56 = vpop.f32.mrf.mxu2 }
 0x228   : > { %v893_v29 = vmul.f32 0.03125, %v875_v56 }
 0x22a   : > { %1133 = vmatmul.f32.gmra.mxu3 %v893_v29 }
 0x22f   : > { %v1008_v60 = vpop.f32.mrf.mxu2 }
 0x230   : > { %v1009_v34 = vadd.f32 %v1008_v60, %v2473_v30 }
 0x235   : > { %v1089_v14 = vpop.f32.mrf.mxu3 }
 0x236   : > { %v1137_v0 = vadd.f32 %v1089_v14, %v1009_v34 }
 0x237   : > { %v1011_v41 = vpop.f32.mrf.mxu2 }
 0x238   : > { %v1157_v38 = vadd.f32 %v2529_v63, %v1137_v0  ;;  %v1012_v18 = vadd.f32 %v1011_v41, %v2477_v37 }
 0x23a   : > { %v1173_v1 = vmax.f32 %v1157_v38, 0.0 }
 0x23c   : > { %1225 = vmatmul.f32.vlgmr.msrb.gmra.mxu0 %v1173_v1 }
 0x23d   : > { %v1092_v40 = vpop.f32.mrf.mxu3 }
 0x23e   : > { %v1138_v5 = vadd.f32 %v1092_v40, %v1012_v18 }
 0x23f   : > { %v1014_v6 = vpop.f32.mrf.mxu2 }
 0x240   : > { %v1158_v7 = vadd.f32 %v2529_v63, %v1138_v5  ;;  %v1015_v43 = vadd.f32 %v1014_v6, %v2481_v51 }
 0x242   : > { %v1174_v30 = vmax.f32 %v1158_v7, 0.0 }
 0x244   : > { %1228 = vmatmul.f32.gmra.mxu0 %v1174_v30 }
 0x245   : > { %v1095_v10 = vpop.f32.mrf.mxu3 }
 0x246   : > { %v1139_v11 = vadd.f32 %v1095_v10, %v1015_v43 }
 0x247   : > { %v1017_v44 = vpop.f32.mrf.mxu2 }
 0x248   : > { %v1159_v13 = vadd.f32 %v2529_v63, %v1139_v11  ;;  %v1018_v16 = vadd.f32 %v1017_v44, %v2484_v39 }
 0x24a   : > { %v1175_v46 = vmax.f32 %v1159_v13, 0.0 }
 0x24c   : > { %1231 = vmatmul.f32.gmra.mxu0 %v1175_v46 }
 0x24d   : > { %v1098_v37 = vpop.f32.mrf.mxu3 }
 0x24e   : > { %v1140_v45 = vadd.f32 %v1098_v37, %v1018_v16 }
 0x24f   : > { %v1020_v48 = vpop.f32.mrf.mxu2 }
 0x250   : > { %v1160_v20 = vadd.f32 %v2529_v63, %v1140_v45  ;;  %v1021_v50 = vadd.f32 %v1020_v48, %v2488_v22 }
 0x252   : > { %v1176_v21 = vmax.f32 %v1160_v20, 0.0 }
 0x254   : > { %1234 = vmatmul.f32.gmra.mxu0 %v1176_v21 }
 0x255   : > { %v1101_v51 = vpop.f32.mrf.mxu3 }
 0x256   : > { %v1141_v24 = vadd.f32 %v1101_v51, %v1021_v50 }
 0x257   : > { %v1023_v47 = vpop.f32.mrf.mxu2 }
 0x258   : > { %v1161_v25 = vadd.f32 %v2529_v63, %v1141_v24  ;;  %v1024_v27 = vadd.f32 %v1023_v47, %v2491_v59 }
 0x25a   : > { %v1177_v26 = vmax.f32 %v1161_v25, 0.0 }
 0x25c   : > { %1237 = vmatmul.f32.gmra.mxu0 %v1177_v26 }
 0x25d   : > { %v1104_v39 = vpop.f32.mrf.mxu3 }
 0x25e   : > { %v1142_v28 = vadd.f32 %v1104_v39, %v1024_v27 }
 0x25f   : > { %v1026_v49 = vpop.f32.mrf.mxu2 }
 0x260   : > { %v1162_v61 = vadd.f32 %v2529_v63, %v1142_v28  ;;  %v1027_v2 = vadd.f32 %v1026_v49, %v2494_v36 }
 0x262   : > { %v1178_v31 = vmax.f32 %v1162_v61, 0.0 }
 0x264   : > { %1240 = vmatmul.f32.gmra.mxu0 %v1178_v31 }
 0x265   : > { %v1107_v22 = vpop.f32.mrf.mxu3 }
 0x266   : > { %v1143_v33 = vadd.f32 %v1107_v22, %v1027_v2 }
 0x267   : > { %v1029_v52 = vpop.f32.mrf.mxu2 }
 0x268   : > { %v1163_v53 = vadd.f32 %v2529_v63, %v1143_v33  ;;  %v1030_v8 = vadd.f32 %v1029_v52, %v2497_v4 }
 0x26a   : > { %v1179_v54 = vmax.f32 %v1163_v53, 0.0 }
 0x26c   : > { %1243 = vmatmul.f32.gmra.mxu0 %v1179_v54  ;;  %v1676_v54 = vld [vmem:[%s2274_s21] sm:$0xff] }
 0x26d   : > { %v1110_v59 = vpop.f32.mrf.mxu3 }
 0x26e   : > { %v1144_v57 = vadd.f32 %v1110_v59, %v1030_v8  ;;  %v1677_v59 = vld [vmem:[%s2274_s21 + $0x8] sm:$0xff] }
 0x26f   : > { %v1032_v56 = vpop.f32.mrf.mxu2 }
 0x270   : > { %v1164_v29 = vadd.f32 %v2529_v63, %v1144_v57  ;;  %v1033_v34 = vadd.f32 %v1032_v56, %v2501_v42 }
 0x272   : > { %v1180_v60 = vmax.f32 %v1164_v29, 0.0 }
 0x274   : > { %1246 = vmatmul.f32.gmra.mxu0 %v1180_v60  ;;  %v1678_v60 = vld [vmem:[%s2274_s21 + $0x10] sm:$0xff] }
 0x275   : > { %v1113_v36 = vpop.f32.mrf.mxu3 }
 0x276   : > { %v1145_v14 = vadd.f32 %v1113_v36, %v1033_v34 }
 0x277   : > { %v1035_v0 = vpop.f32.mrf.mxu2 }
 0x278   : > { %v1165_v41 = vadd.f32 %v2529_v63, %v1145_v14  ;;  %v1036_v1 = vadd.f32 %v1035_v0, %v2504_v12  ;;  %v1679_v0 = vld [vmem:[%s2274_s21 + $0x18] sm:$0xff] }
 0x27a   : > { %v1181_v38 = vmax.f32 %v1165_v41, 0.0 }
 0x27c   : > { %1249 = vmatmul.f32.gmra.mxu0 %v1181_v38 }
 0x27d   : > { %v1116_v4 = vpop.f32.mrf.mxu3 }
 0x27e   : > { %v1146_v18 = vadd.f32 %v1116_v4, %v1036_v1  ;;  %v1680_v4 = vld [vmem:[%s2274_s21 + $0x20] sm:$0xff] }
 0x27f   : > { %v1038_v40 = vpop.f32.mrf.mxu2 }
 0x280   : > { %v1166_v5 = vadd.f32 %v2529_v63, %v1146_v18  ;;  %v1039_v7 = vadd.f32 %v1038_v40, %v2507_v17 }
 0x282   : > { %v1182_v6 = vmax.f32 %v1166_v5, 0.0 }
 0x284   : > { %1252 = vmatmul.f32.gmra.mxu0 %v1182_v6  ;;  %v1681_v6 = vld [vmem:[%s2274_s21 + $0x28] sm:$0xff] }
 0x285   : > { %v1119_v42 = vpop.f32.mrf.mxu3 }
 0x286   : > { %v1147_v30 = vadd.f32 %v1119_v42, %v1039_v7 }
 0x287   : > { %v1041_v43 = vpop.f32.mrf.mxu2 }
 0x288   : > { %v1167_v10 = vadd.f32 %v2529_v63, %v1147_v30  ;;  %v1042_v44 = vadd.f32 %v1041_v43, %v2510_v23  ;;  %v1682_v43 = vld [vmem:[%s2274_s21 + $0x30] sm:$0xff] }
 0x28a   : > { %v1183_v11 = vmax.f32 %v1167_v10, 0.0 }
 0x28c   : > { %1255 = vmatmul.f32.vlgmr.msrb.gmra.mxu1 %v1183_v11 }
 0x28d   : > { %v1122_v12 = vpop.f32.mrf.mxu3 }
 0x28e   : > { %v1148_v13 = vadd.f32 %v1122_v12, %v1042_v44  ;;  %v1683_v12 = vld [vmem:[%s2274_s21 + $0x38] sm:$0xff] }
 0x28f   : > { %v1044_v46 = vpop.f32.mrf.mxu2 }
 0x290   : > { %v1168_v16 = vadd.f32 %v2529_v63, %v1148_v13  ;;  %v1045_v45 = vadd.f32 %v1044_v46, %v2514_v55 }
 0x292   : > { %v1184_v37 = vmax.f32 %v1168_v16, 0.0 }
 0x294   : > { %1258 = vmatmul.f32.gmra.mxu1 %v1184_v37  ;;  %v1684_v37 = vld [vmem:[%s2274_s21 + $0x40] sm:$0xff] }
 0x295   : > { %v1125_v17 = vpop.f32.mrf.mxu3 }
 0x296   : > { %v1149_v48 = vadd.f32 %v1125_v17, %v1045_v45 }
 0x297   : > { %v1047_v20 = vpop.f32.mrf.mxu2 }
 0x298   : > { %v1169_v21 = vadd.f32 %v2529_v63, %v1149_v48  ;;  %v1048_v51 = vadd.f32 %v1047_v20, %v2517_v35  ;;  %v1685_v20 = vld [vmem:[%s2274_s21 + $0x48] sm:$0xff] }
 0x29a   : > { %v1185_v50 = vmax.f32 %v1169_v21, 0.0 }
 0x29c   : > { %1261 = vmatmul.f32.gmra.mxu1 %v1185_v50 }
 0x29d   : > { %v1128_v23 = vpop.f32.mrf.mxu3 }
 0x29e   : > { %v1150_v24 = vadd.f32 %v1128_v23, %v1048_v51  ;;  %v1686_v23 = vld [vmem:[%s2274_s21 + $0x50] sm:$0xff] }
 0x29f   : > { %v1050_v47 = vpop.f32.mrf.mxu2 }
 0x2a0   : > { %v1170_v25 = vadd.f32 %v2529_v63, %v1150_v24  ;;  %v1051_v27 = vadd.f32 %v1050_v47, %v2520_v58  ;;  %v2565_v58 = vld [vmem:[%s2661_s10] ss:$0 sm:$0xff] }
 0x2a2   : > { %v1186_v26 = vmax.f32 %v1170_v25, 0.0 }
 0x2a4   : > { %1264 = vmatmul.f32.gmra.mxu1 %v1186_v26 }
 0x2a5   : > { %v1131_v55 = vpop.f32.mrf.mxu3 }
 0x2a6   : > { %v1151_v39 = vadd.f32 %v1131_v55, %v1051_v27 }
 0x2a7   : > { %v1053_v49 = vpop.f32.mrf.mxu2 }
 0x2a8   : > { %v1171_v28 = vadd.f32 %v2529_v63, %v1151_v39  ;;  %v1054_v35 = vadd.f32 %v1053_v49, %v2523_v32 }
 0x2aa   : > { %v1187_v61 = vmax.f32 %v1171_v28, 0.0 }
 0x2ac   : > { %1267 = vmatmul.f32.gmra.mxu1 %v1187_v61 }
 0x2ad   : > { %v1134_v31 = vpop.f32.mrf.mxu3 }
 0x2ae   : > { %v1152_v2 = vadd.f32 %v1134_v31, %v1054_v35 }
 0x2b0   : > { %v1172_v22 = vadd.f32 %v2529_v63, %v1152_v2 }
 0x2b2   : > { %v1188_v33 = vmax.f32 %v1172_v22, 0.0 }
 0x2b4   : > { %1270 = vmatmul.f32.gmra.mxu1 %v1188_v33 }
 0x2b9   : > { %v1226_v52 = vpop.f32.mrf.mxu0 }
 0x2ba   : > { %v1227_v53 = vadd.f32 %v2565_v58, %v1226_v52 }
 0x2bc   : > { %v1274_v32 = vadd.f32 %v1676_v54, %v1227_v53 }
 0x2be   : > { %1290 = vst [vmem:[%s2570_s26] sm:$0xff] %v1274_v32 }
 0x2c1   : > { %v1229_v63 = vpop.f32.mrf.mxu0 }
 0x2c2   : > { %v1230_v8 = vadd.f32 %v2565_v58, %v1229_v63 }
 0x2c4   : > { %v1275_v57 = vadd.f32 %v1677_v59, %v1230_v8 }
 0x2c6   : > { %1291 = vst [vmem:[%s2570_s26 + $0x8] sm:$0xff] %v1275_v57 }
 0x2c9   : > { %v1232_v56 = vpop.f32.mrf.mxu0 }
 0x2ca   : > { %v1233_v29 = vadd.f32 %v2565_v58, %v1232_v56 }
 0x2cc   : > { %v1276_v34 = vadd.f32 %v1678_v60, %v1233_v29 }
 0x2ce   : > { %1292 = vst [vmem:[%s2570_s26 + $0x10] sm:$0xff] %v1276_v34 }
 0x2d1   : > { %v1235_v36 = vpop.f32.mrf.mxu0 }
 0x2d2   : > { %v1236_v14 = vadd.f32 %v2565_v58, %v1235_v36 }
 0x2d4   : > { %v1277_v41 = vadd.f32 %v1679_v0, %v1236_v14 }
 0x2d6   : > { %1293 = vst [vmem:[%s2570_s26 + $0x18] sm:$0xff] %v1277_v41 }
 0x2d9   : > { %v1238_v38 = vpop.f32.mrf.mxu0 }
 0x2da   : > { %v1239_v1 = vadd.f32 %v2565_v58, %v1238_v38 }
 0x2dc   : > { %v1278_v18 = vadd.f32 %v1680_v4, %v1239_v1 }
 0x2de   : > { %1294 = vst [vmem:[%s2570_s26 + $0x20] sm:$0xff] %v1278_v18 }
 0x2e1   : > { %v1241_v40 = vpop.f32.mrf.mxu0 }
 0x2e2   : > { %v1242_v5 = vadd.f32 %v2565_v58, %v1241_v40 }
 0x2e4   : > { %v1279_v7 = vadd.f32 %v1681_v6, %v1242_v5 }
 0x2e6   : > { %1295 = vst [vmem:[%s2570_s26 + $0x28] sm:$0xff] %v1279_v7 }
 0x2e9   : > { %v1244_v42 = vpop.f32.mrf.mxu0 }
 0x2ea   : > { %v1245_v30 = vadd.f32 %v2565_v58, %v1244_v42 }
 0x2ec   : > { %v1280_v10 = vadd.f32 %v1682_v43, %v1245_v30 }
 0x2ee   : > { %1296 = vst [vmem:[%s2570_s26 + $0x30] sm:$0xff] %v1280_v10 }
 0x2f1   : > { %v1247_v11 = vpop.f32.mrf.mxu0 }
 0x2f2   : > { %v1248_v44 = vadd.f32 %v2565_v58, %v1247_v11 }
 0x2f4   : > { %v1281_v13 = vadd.f32 %v1683_v12, %v1248_v44 }
 0x2f6   : > { %1297 = vst [vmem:[%s2570_s26 + $0x38] sm:$0xff] %v1281_v13 }
 0x2f9   : > { %v1250_v46 = vpop.f32.mrf.mxu0 }
 0x2fa   : > { %v1251_v16 = vadd.f32 %v2565_v58, %v1250_v46 }
 0x2fc   : > { %v1282_v45 = vadd.f32 %v1684_v37, %v1251_v16 }
 0x2fe   : > { %1298 = vst [vmem:[%s2570_s26 + $0x40] sm:$0xff] %v1282_v45 }
 0x301   : > { %v1253_v17 = vpop.f32.mrf.mxu0 }
 0x302   : > { %v1254_v48 = vadd.f32 %v2565_v58, %v1253_v17 }
 0x304   : > { %v1283_v21 = vadd.f32 %v1685_v20, %v1254_v48 }
 0x306   : > { %1299 = vst [vmem:[%s2570_s26 + $0x48] sm:$0xff] %v1283_v21 }
 0x309   : > { %v1256_v50 = vpop.f32.mrf.mxu1 }
 0x30a   : > { %v1257_v51 = vadd.f32 %v2565_v58, %v1256_v50 }
 0x30c   : > { %v1284_v24 = vadd.f32 %v1686_v23, %v1257_v51 }
 0x30e   : > { %1300 = vst [vmem:[%s2570_s26 + $0x50] sm:$0xff] %v1284_v24 }
 0x311   : > { %v1259_v47 = vpop.f32.mrf.mxu1 }
 0x312   : > { %v1260_v25 = vadd.f32 %v2565_v58, %v1259_v47 }
 0x314   : > { %v1285_v26 = vadd.f32 %v1260_v25, %v2388_v62 }
 0x316   : > { %1301 = vst [vmem:[%s2570_s26 + $0x58] sm:$0xff] %v1285_v26 }
 0x319   : > { %v1262_v27 = vpop.f32.mrf.mxu1 }
 0x31a   : > { %v1263_v55 = vadd.f32 %v2565_v58, %v1262_v27 }
 0x31c   : > { %v1286_v39 = vadd.f32 %v1263_v55, %v2396_v3 }
 0x31e   : > { %1302 = vst [vmem:[%s2570_s26 + $0x60] sm:$0xff] %v1286_v39 }
 0x321   : > { %v1265_v28 = vpop.f32.mrf.mxu1 }
 0x322   : > { %v1266_v49 = vadd.f32 %v2565_v58, %v1265_v28 }
 0x324   : > { %v1287_v61 = vadd.f32 %v1266_v49, %v2404_v9 }
 0x326   : > { %1303 = vst [vmem:[%s2570_s26 + $0x68] sm:$0xff] %v1287_v61 }
 0x329   : > { %v1268_v35 = vpop.f32.mrf.mxu1 }
 0x32a   : > { %v1269_v31 = vadd.f32 %v2565_v58, %v1268_v35 }
 0x32c   : > { %v1288_v62 = vadd.f32 %v1269_v31, %v2413_v15 }
 0x32e   : > { %1304 = vst [vmem:[%s2570_s26 + $0x70] sm:$0xff] %v1288_v62 }
 0x331   : > { %v1271_v3 = vpop.f32.mrf.mxu1 }
 0x332   : > { %v1272_v2 = vadd.f32 %v2565_v58, %v1271_v3 }
 0x334   : > { %v1289_v9 = vadd.f32 %v1272_v2, %v2422_v19 }
 0x336   : > { %1305 = vst [vmem:[%s2570_s26 + $0x78] sm:$0xff] %v1289_v9 }
 0x337   : > { %1954 = shalt.err (!%p1951_p8)
}
 0x338   : > { %s2024_s19 = smov 128   ;;  %s2025_s23 = smov 8  }
 0x339   : > { %1584 = dma.vmem_to_hbm [thread:$0]  (%p2200_p2), %s1320_s7, 2048, %s1322_s3, %s1307_s27, %s2024_s19, %s2024_s19, %s2025_s23  }
 0x33a PF: > { %p1629_p9 = scmp.ge.s32.totalorder %s2013_s20, 2  ;;  %s1336_s9 = sand.u32 1, %s2001_s17  }
 0x33b   : > { %s1337_s29 = scalar_lea.sflag [#allocation4], %s1336_s9 }
 0x33c   : > { %p1613_p10 = pnand %p1629_p9, %p2204_p4 }
 0x33e   : > { %p1614_p12 = pneg %p1613_p10 }
 0x340   : > { %1996 = dma.done.wait (%p1614_p12), %s1337_s29, 2048  }
 0x341   : > { %1998 = vsyncadd (%p1614_p12), %s1337_s29, 4294965248  ;;  %s2696_s20 = sld [smem:[#allocation25_spill]]  ;;  %s2699_s17 = smov %s2005_s18 }
 0x342   : > { %s2697_s16 = sld [smem:[#allocation24_spill]] }
 0x343   : > { %s2698_s19 = sld [smem:[#allocation26_spill]] }
 0x347   : > { %p30_p13 = scmp.ge.s32.totalorder %s2696_s20, 6  }
 0x348   : > { %s2700_s18 = smov %s2697_s16 }
 0x349   :  { %32 = sbr.rel (!%p30_p13) target bundleno = 18 (0x12), region = 146 }
 0x34e   :  { %1343 = vsyncpa [#allocation3], 1 }
 0x34f   :  { %1345 = vsyncpa [#allocation3 + $0x1], 1 }
 0x350   :  { %1346 = vsyncpa [#allocation6], 1 }
 0x351   :  { %1348 = vsyncpa [#allocation6 + $0x1], 1 }
 0x352   :  { %1349 = vsyncpa [#allocation9], 1 }
 0x353   :  { %1350 = vsyncpa [#allocation12], 1 }
 0x354   :  { %1351 = vsyncpa [#allocation15], 1 }
 0x355   :  { %1352 = vsyncpa [#allocation4], 1 }
 0x356   :  { %1354 = vsyncpa [#allocation4 + $0x1], 1 }

</bundles_post_ra>
